<compile_context>
chip_gen: v7x
topology: tpu7x:2x2x1
jax: 0.10.0
libtpu: 0.0.40
codegen_flags: <defaults>
</compile_context>

<pallas_src>
import numpy as np
import jax
import jax.numpy as jnp
from jax.experimental import pallas as pl
from jax.experimental.pallas import tpu as pltpu

_GELU_C = 0.7978845608028654  # sqrt(2/pi)


def _gelu(h):
    return 0.5 * h * (1.0 + jnp.tanh(_GELU_C * (h + 0.044715 * h * h * h)))


def _pick_t_tile(T, max_tile=1024):
    """Largest multiple of 128 that divides T (<= max_tile); else full T."""
    if T % 128 != 0:
        return T
    tt = min(max_tile, T)
    tt -= tt % 128
    tt = max(tt, 128)
    while T % tt != 0:
        tt -= 128
    return tt


def conditioned_sequential_kernel(x_ref, m_ref,
                                  w1_ref, b1_ref, e_ref, w2_ref, b2_ref,
                                  out_ref):
    """One (batch, T-tile) step of the ConditionedSequential stack.

    x_ref : (1, C, Tt) bf16   running activation block (T on lanes)
    m_ref : (1, D, 1)  f32    conditioning vector for this batch element
    w1_ref: (L, H, C)  bf16   per-block input 1x1-conv weights
    b1_ref: (L, H, 1)  f32
    e_ref : (L, H, D)  f32    per-block mapping projections
    w2_ref: (L, C, H)  bf16   per-block output 1x1-conv weights
    b2_ref: (L, C, 1)  f32
    out_ref:(1, C, Tt) f32
    """
    x = x_ref[0].astype(jnp.float32)          # (C, Tt) residual stream, f32
    m = m_ref[0]                              # (D, 1)

    n_blocks = w1_ref.shape[0]
    for l in range(n_blocks):                 # static unroll; n_blocks is small
        # conditioning: tiny (H,D)@(D,1) matmul shared by the whole tile
        cond = jnp.dot(e_ref[l], m, preferred_element_type=jnp.float32)   # (H,1)
        # 1x1 conv C->H on the MXU: (H,C) @ (C,Tt) -> (H,Tt)
        h = jnp.dot(w1_ref[l], x.astype(jnp.bfloat16),
                    preferred_element_type=jnp.float32)
        h = _gelu(h + b1_ref[l] + cond).astype(jnp.bfloat16)
        # 1x1 conv H->C on the MXU: (C,H) @ (H,Tt) -> (C,Tt)
        y = jnp.dot(w2_ref[l], h, preferred_element_type=jnp.float32)
        x = x + y + b2_ref[l]                 # residual update = block output

    out_ref[0] = x.astype(out_ref.dtype)      # lane-dense (Tt mult. of 128) store


def conditioned_sequential(x_bct, mapping_bd, params, t_tile=None):
    """x_bct: (B, C, T) f32 (PyTorch NCL layout); mapping_bd: (B, D) f32."""
    B, C, T = x_bct.shape
    w1, b1, e, w2, b2 = params                # (L,H,C),(L,H,1),(L,H,D),(L,C,H),(L,C,1)
    L, H, _ = w1.shape
    D = e.shape[2]

    # big tensor: bf16 HBM storage, native NCL layout (no wrapper transpose)
    x = x_bct.astype(jnp.bfloat16)
    # mapping as a (D, 1) column per batch element so the kernel can matmul it
    m = mapping_bd.reshape(B, D, 1).astype(jnp.float32)
    # tiny weights: bf16 for MXU inputs, f32 for biases / mapping projection
    w1b = w1.astype(jnp.bfloat16)
    w2b = w2.astype(jnp.bfloat16)
    b1f = b1.astype(jnp.float32)
    b2f = b2.astype(jnp.float32)
    ef = e.astype(jnp.float32)

    if t_tile is None:
        t_tile = _pick_t_tile(T)
    assert T % t_tile == 0
    nt = T // t_tile

    return pl.pallas_call(
        conditioned_sequential_kernel,
        out_shape=jax.ShapeDtypeStruct((B, C, T), jnp.float32),
        grid_spec=pltpu.PrefetchScalarGridSpec(
            num_scalar_prefetch=0,
            grid=(B, nt),
            in_specs=[
                pl.BlockSpec((1, C, t_tile), lambda b, t: (b, 0, t)),   # x
                pl.BlockSpec((1, D, 1),      lambda b, t: (b, 0, 0)),   # mapping
                pl.BlockSpec((L, H, C),      lambda b, t: (0, 0, 0)),   # w1
                pl.BlockSpec((L, H, 1),      lambda b, t: (0, 0, 0)),   # b1
                pl.BlockSpec((L, H, D),      lambda b, t: (0, 0, 0)),   # e
                pl.BlockSpec((L, C, H),      lambda b, t: (0, 0, 0)),   # w2
                pl.BlockSpec((L, C, 1),      lambda b, t: (0, 0, 0)),   # b2
            ],
            out_specs=pl.BlockSpec((1, C, t_tile), lambda b, t: (b, 0, t)),
        ),
        compiler_params=pltpu.CompilerParams(
            dimension_semantics=("parallel", "parallel")),  # fully independent blocks
    )(x, m, w1b, b1f, ef, w2b, b2f)


def ref_forward(x_bct, mapping_bd, params):
    """Pure-JAX reference with the same bf16 storage / MXU-input rounding."""
    w1, b1, e, w2, b2 = params
    f32 = jnp.float32
    x = x_bct.astype(jnp.bfloat16).astype(f32)          # (B, C, T)
    m = mapping_bd.astype(f32)                          # (B, D)
    L = w1.shape[0]
    for l in range(L):
        cond = jnp.einsum('hd,bd->bh', e[l].astype(f32), m)[:, :, None]   # (B,H,1)
        h = jnp.einsum('hc,bct->bht',
                       w1[l].astype(jnp.bfloat16).astype(f32),
                       x.astype(jnp.bfloat16).astype(f32))
        h = _gelu(h + b1[l][None].astype(f32) + cond).astype(jnp.bfloat16).astype(f32)
        y = jnp.einsum('ch,bht->bct', w2[l].astype(jnp.bfloat16).astype(f32), h)
        x = x + y + b2[l][None].astype(f32)
    return x


if __name__ == "__main__":
    # small audio-shaped problem: B=2 waveforms, C=4 channels, T=2048 samples,
    # hidden H=32, mapping dim D=8, L=3 conditioned blocks in the sequence.
    B, C, T, H, D, L = 2, 4, 2048, 32, 8, 3

    key = jax.random.PRNGKey(0)
    kx, km, k1, k2, k3, k4, k5 = jax.random.split(key, 7)

    # inputs (PyTorch NCL layout); x in [-1, 1] like audio waveforms
    x = jnp.tanh(jax.random.normal(kx, (B, C, T), dtype=jnp.float32))
    mapping = jax.random.normal(km, (B, D), dtype=jnp.float32)

    # deterministic synthetic parameters for the L conditioned blocks
    # TODO(synk): the real module_list contents are construction-time arguments
    # of ConditionedSequential; we synthesize conditioned residual 1x1-conv
    # blocks with the same (x, mapping) -> x signature.
    w1 = 0.3 * jax.random.normal(k1, (L, H, C), dtype=jnp.float32)
    b1 = 0.1 * jax.random.normal(k2, (L, H, 1), dtype=jnp.float32)
    e = 0.1 * jax.random.normal(k3, (L, H, D), dtype=jnp.float32)
    w2 = 0.3 * jax.random.normal(k4, (L, C, H), dtype=jnp.float32)
    b2 = 0.1 * jax.random.normal(k5, (L, C, 1), dtype=jnp.float32)
    params = (w1, b1, e, w2, b2)

    out = jax.block_until_ready(conditioned_sequential(x, mapping, params))
    expected = jax.block_until_ready(ref_forward(x, mapping, params))
    np.testing.assert_allclose(np.asarray(out), np.asarray(expected),
                               rtol=1e-3, atol=1e-3)

    print("KERNEL_OK")
</pallas_src>

<mosaic_0001>
module attributes {stable_mosaic.version = 11 : i64} {
  func.func @conditioned_sequential_kernel(%arg0: i32, %arg1: i32, %arg2: memref<1x4x1024xbf16, #tpu.memory_space<vmem>>, %arg3: memref<1x8x1xf32, #tpu.memory_space<vmem>>, %arg4: memref<3x32x4xbf16, #tpu.memory_space<vmem>>, %arg5: memref<3x32x1xf32, #tpu.memory_space<vmem>>, %arg6: memref<3x32x8xf32, #tpu.memory_space<vmem>>, %arg7: memref<3x4x32xbf16, #tpu.memory_space<vmem>>, %arg8: memref<3x4x1xf32, #tpu.memory_space<vmem>>, %arg9: memref<1x4x1024xf32, #tpu.memory_space<vmem>>) attributes {dimension_semantics = [#tpu.dimension_semantics<parallel>, #tpu.dimension_semantics<parallel>], iteration_bounds = array<i64: 2, 2>, scalar_prefetch = 0 : i64, scratch_operands = 0 : i64, tpu.core_type = #tpu.core_type<tc>, window_params = [{transform_indices = @transform_0, window_bounds = array<i64: 1, 4, 1024>}, {transform_indices = @transform_1, window_bounds = array<i64: 1, 8, 1>}, {pipeline_mode = #tpu.pipeline_mode<synchronous>, transform_indices = @transform_2, window_bounds = array<i64: 3, 32, 4>}, {pipeline_mode = #tpu.pipeline_mode<synchronous>, transform_indices = @transform_3, window_bounds = array<i64: 3, 32, 1>}, {pipeline_mode = #tpu.pipeline_mode<synchronous>, transform_indices = @transform_4, window_bounds = array<i64: 3, 32, 8>}, {pipeline_mode = #tpu.pipeline_mode<synchronous>, transform_indices = @transform_5, window_bounds = array<i64: 3, 4, 32>}, {pipeline_mode = #tpu.pipeline_mode<synchronous>, transform_indices = @transform_6, window_bounds = array<i64: 3, 4, 1>}, {transform_indices = @transform_7, window_bounds = array<i64: 1, 4, 1024>}]} {
    %c0 = arith.constant 0 : index
    %c0_0 = arith.constant 0 : index
    %c0_1 = arith.constant 0 : index
    %0 = vector.load %arg2[%c0, %c0_0, %c0_1] : memref<1x4x1024xbf16, #tpu.memory_space<vmem>>, vector<1x4x1024xbf16>
    %1 = vector.shape_cast %0 : vector<1x4x1024xbf16> to vector<4x1024xbf16>
    %2 = arith.extf %1 : vector<4x1024xbf16> to vector<4x1024xf32>
    %c0_2 = arith.constant 0 : index
    %c0_3 = arith.constant 0 : index
    %c0_4 = arith.constant 0 : index
    %3 = vector.load %arg3[%c0_2, %c0_3, %c0_4] : memref<1x8x1xf32, #tpu.memory_space<vmem>>, vector<1x8x1xf32>
    %4 = vector.shape_cast %3 : vector<1x8x1xf32> to vector<8x1xf32>
    %c0_5 = arith.constant 0 : index
    %c0_6 = arith.constant 0 : index
    %c0_7 = arith.constant 0 : index
    %5 = vector.load %arg6[%c0_5, %c0_6, %c0_7] : memref<3x32x8xf32, #tpu.memory_space<vmem>>, vector<1x32x8xf32>
    %6 = vector.shape_cast %5 : vector<1x32x8xf32> to vector<32x8xf32>
    %cst = arith.constant dense<0.000000e+00> : vector<32x1xf32>
    %7 = tpu.matmul %6, %4, %cst {dimension_numbers = #tpu.dot_dimension_numbers<[1], [0], [0], [1], [0, 0, 1, 1], [], []>} : vector<32x8xf32>, vector<8x1xf32>, vector<32x1xf32> -> vector<32x1xf32>
    %c0_8 = arith.constant 0 : index
    %c0_9 = arith.constant 0 : index
    %c0_10 = arith.constant 0 : index
    %8 = vector.load %arg4[%c0_8, %c0_9, %c0_10] : memref<3x32x4xbf16, #tpu.memory_space<vmem>>, vector<1x32x4xbf16>
    %9 = vector.shape_cast %8 : vector<1x32x4xbf16> to vector<32x4xbf16>
    %10 = arith.truncf %2 : vector<4x1024xf32> to vector<4x1024xbf16>
    %cst_11 = arith.constant dense<0.000000e+00> : vector<32x1024xf32>
    %11 = tpu.matmul %9, %10, %cst_11 {dimension_numbers = #tpu.dot_dimension_numbers<[1], [0], [0], [1], [0, 0, 1, 1], [], []>} : vector<32x4xbf16>, vector<4x1024xbf16>, vector<32x1024xf32> -> vector<32x1024xf32>
    %c0_12 = arith.constant 0 : index
    %c0_13 = arith.constant 0 : index
    %c0_14 = arith.constant 0 : index
    %12 = vector.load %arg5[%c0_12, %c0_13, %c0_14] : memref<3x32x1xf32, #tpu.memory_space<vmem>>, vector<1x32x1xf32>
    %13 = vector.shape_cast %12 : vector<1x32x1xf32> to vector<32x1xf32>
    %14 = vector.broadcast %13 : vector<32x1xf32> to vector<32x1024xf32>
    %15 = arith.addf %11, %14 : vector<32x1024xf32>
    %16 = vector.broadcast %7 : vector<32x1xf32> to vector<32x1024xf32>
    %17 = arith.addf %15, %16 : vector<32x1024xf32>
    %cst_15 = arith.constant 5.000000e-01 : f32
    %18 = vector.broadcast %cst_15 : f32 to vector<32x1024xf32>
    %19 = arith.mulf %18, %17 : vector<32x1024xf32>
    %cst_16 = arith.constant 4.471500e-02 : f32
    %20 = vector.broadcast %cst_16 : f32 to vector<32x1024xf32>
    %21 = arith.mulf %20, %17 : vector<32x1024xf32>
    %22 = arith.mulf %21, %17 : vector<32x1024xf32>
    %23 = arith.mulf %22, %17 : vector<32x1024xf32>
    %24 = arith.addf %17, %23 : vector<32x1024xf32>
    %cst_17 = arith.constant 0.797884583 : f32
    %25 = vector.broadcast %cst_17 : f32 to vector<32x1024xf32>
    %26 = arith.mulf %25, %24 : vector<32x1024xf32>
    %27 = math.tanh %26 : vector<32x1024xf32>
    %cst_18 = arith.constant 1.000000e+00 : f32
    %28 = vector.broadcast %cst_18 : f32 to vector<32x1024xf32>
    %29 = arith.addf %28, %27 : vector<32x1024xf32>
    %30 = arith.mulf %19, %29 : vector<32x1024xf32>
    %31 = arith.truncf %30 : vector<32x1024xf32> to vector<32x1024xbf16>
    %c0_19 = arith.constant 0 : index
    %c0_20 = arith.constant 0 : index
    %c0_21 = arith.constant 0 : index
    %32 = vector.load %arg7[%c0_19, %c0_20, %c0_21] : memref<3x4x32xbf16, #tpu.memory_space<vmem>>, vector<1x4x32xbf16>
    %33 = vector.shape_cast %32 : vector<1x4x32xbf16> to vector<4x32xbf16>
    %cst_22 = arith.constant dense<0.000000e+00> : vector<4x1024xf32>
    %34 = tpu.matmul %33, %31, %cst_22 {dimension_numbers = #tpu.dot_dimension_numbers<[1], [0], [0], [1], [0, 0, 1, 1], [], []>} : vector<4x32xbf16>, vector<32x1024xbf16>, vector<4x1024xf32> -> vector<4x1024xf32>
    %35 = arith.addf %2, %34 : vector<4x1024xf32>
    %c0_23 = arith.constant 0 : index
    %c0_24 = arith.constant 0 : index
    %c0_25 = arith.constant 0 : index
    %36 = vector.load %arg8[%c0_23, %c0_24, %c0_25] : memref<3x4x1xf32, #tpu.memory_space<vmem>>, vector<1x4x1xf32>
    %37 = vector.shape_cast %36 : vector<1x4x1xf32> to vector<4x1xf32>
    %38 = vector.broadcast %37 : vector<4x1xf32> to vector<4x1024xf32>
    %39 = arith.addf %35, %38 : vector<4x1024xf32>
    %c1 = arith.constant 1 : index
    %c0_26 = arith.constant 0 : index
    %c0_27 = arith.constant 0 : index
    %40 = vector.load %arg6[%c1, %c0_26, %c0_27] : memref<3x32x8xf32, #tpu.memory_space<vmem>>, vector<1x32x8xf32>
    %41 = vector.shape_cast %40 : vector<1x32x8xf32> to vector<32x8xf32>
    %cst_28 = arith.constant dense<0.000000e+00> : vector<32x1xf32>
    %42 = tpu.matmul %41, %4, %cst_28 {dimension_numbers = #tpu.dot_dimension_numbers<[1], [0], [0], [1], [0, 0, 1, 1], [], []>} : vector<32x8xf32>, vector<8x1xf32>, vector<32x1xf32> -> vector<32x1xf32>
    %c1_29 = arith.constant 1 : index
    %c0_30 = arith.constant 0 : index
    %c0_31 = arith.constant 0 : index
    %43 = vector.load %arg4[%c1_29, %c0_30, %c0_31] : memref<3x32x4xbf16, #tpu.memory_space<vmem>>, vector<1x32x4xbf16>
    %44 = vector.shape_cast %43 : vector<1x32x4xbf16> to vector<32x4xbf16>
    %45 = arith.truncf %39 : vector<4x1024xf32> to vector<4x1024xbf16>
    %cst_32 = arith.constant dense<0.000000e+00> : vector<32x1024xf32>
    %46 = tpu.matmul %44, %45, %cst_32 {dimension_numbers = #tpu.dot_dimension_numbers<[1], [0], [0], [1], [0, 0, 1, 1], [], []>} : vector<32x4xbf16>, vector<4x1024xbf16>, vector<32x1024xf32> -> vector<32x1024xf32>
    %c1_33 = arith.constant 1 : index
    %c0_34 = arith.constant 0 : index
    %c0_35 = arith.constant 0 : index
    %47 = vector.load %arg5[%c1_33, %c0_34, %c0_35] : memref<3x32x1xf32, #tpu.memory_space<vmem>>, vector<1x32x1xf32>
    %48 = vector.shape_cast %47 : vector<1x32x1xf32> to vector<32x1xf32>
    %49 = vector.broadcast %48 : vector<32x1xf32> to vector<32x1024xf32>
    %50 = arith.addf %46, %49 : vector<32x1024xf32>
    %51 = vector.broadcast %42 : vector<32x1xf32> to vector<32x1024xf32>
    %52 = arith.addf %50, %51 : vector<32x1024xf32>
    %cst_36 = arith.constant 5.000000e-01 : f32
    %53 = vector.broadcast %cst_36 : f32 to vector<32x1024xf32>
    %54 = arith.mulf %53, %52 : vector<32x1024xf32>
    %cst_37 = arith.constant 4.471500e-02 : f32
    %55 = vector.broadcast %cst_37 : f32 to vector<32x1024xf32>
    %56 = arith.mulf %55, %52 : vector<32x1024xf32>
    %57 = arith.mulf %56, %52 : vector<32x1024xf32>
    %58 = arith.mulf %57, %52 : vector<32x1024xf32>
    %59 = arith.addf %52, %58 : vector<32x1024xf32>
    %cst_38 = arith.constant 0.797884583 : f32
    %60 = vector.broadcast %cst_38 : f32 to vector<32x1024xf32>
    %61 = arith.mulf %60, %59 : vector<32x1024xf32>
    %62 = math.tanh %61 : vector<32x1024xf32>
    %cst_39 = arith.constant 1.000000e+00 : f32
    %63 = vector.broadcast %cst_39 : f32 to vector<32x1024xf32>
    %64 = arith.addf %63, %62 : vector<32x1024xf32>
    %65 = arith.mulf %54, %64 : vector<32x1024xf32>
    %66 = arith.truncf %65 : vector<32x1024xf32> to vector<32x1024xbf16>
    %c1_40 = arith.constant 1 : index
    %c0_41 = arith.constant 0 : index
    %c0_42 = arith.constant 0 : index
    %67 = vector.load %arg7[%c1_40, %c0_41, %c0_42] : memref<3x4x32xbf16, #tpu.memory_space<vmem>>, vector<1x4x32xbf16>
    %68 = vector.shape_cast %67 : vector<1x4x32xbf16> to vector<4x32xbf16>
    %cst_43 = arith.constant dense<0.000000e+00> : vector<4x1024xf32>
    %69 = tpu.matmul %68, %66, %cst_43 {dimension_numbers = #tpu.dot_dimension_numbers<[1], [0], [0], [1], [0, 0, 1, 1], [], []>} : vector<4x32xbf16>, vector<32x1024xbf16>, vector<4x1024xf32> -> vector<4x1024xf32>
    %70 = arith.addf %39, %69 : vector<4x1024xf32>
    %c1_44 = arith.constant 1 : index
    %c0_45 = arith.constant 0 : index
    %c0_46 = arith.constant 0 : index
    %71 = vector.load %arg8[%c1_44, %c0_45, %c0_46] : memref<3x4x1xf32, #tpu.memory_space<vmem>>, vector<1x4x1xf32>
    %72 = vector.shape_cast %71 : vector<1x4x1xf32> to vector<4x1xf32>
    %73 = vector.broadcast %72 : vector<4x1xf32> to vector<4x1024xf32>
    %74 = arith.addf %70, %73 : vector<4x1024xf32>
    %c2 = arith.constant 2 : index
    %c0_47 = arith.constant 0 : index
    %c0_48 = arith.constant 0 : index
    %75 = vector.load %arg6[%c2, %c0_47, %c0_48] : memref<3x32x8xf32, #tpu.memory_space<vmem>>, vector<1x32x8xf32>
    %76 = vector.shape_cast %75 : vector<1x32x8xf32> to vector<32x8xf32>
    %cst_49 = arith.constant dense<0.000000e+00> : vector<32x1xf32>
    %77 = tpu.matmul %76, %4, %cst_49 {dimension_numbers = #tpu.dot_dimension_numbers<[1], [0], [0], [1], [0, 0, 1, 1], [], []>} : vector<32x8xf32>, vector<8x1xf32>, vector<32x1xf32> -> vector<32x1xf32>
    %c2_50 = arith.constant 2 : index
    %c0_51 = arith.constant 0 : index
    %c0_52 = arith.constant 0 : index
    %78 = vector.load %arg4[%c2_50, %c0_51, %c0_52] : memref<3x32x4xbf16, #tpu.memory_space<vmem>>, vector<1x32x4xbf16>
    %79 = vector.shape_cast %78 : vector<1x32x4xbf16> to vector<32x4xbf16>
    %80 = arith.truncf %74 : vector<4x1024xf32> to vector<4x1024xbf16>
    %cst_53 = arith.constant dense<0.000000e+00> : vector<32x1024xf32>
    %81 = tpu.matmul %79, %80, %cst_53 {dimension_numbers = #tpu.dot_dimension_numbers<[1], [0], [0], [1], [0, 0, 1, 1], [], []>} : vector<32x4xbf16>, vector<4x1024xbf16>, vector<32x1024xf32> -> vector<32x1024xf32>
    %c2_54 = arith.constant 2 : index
    %c0_55 = arith.constant 0 : index
    %c0_56 = arith.constant 0 : index
    %82 = vector.load %arg5[%c2_54, %c0_55, %c0_56] : memref<3x32x1xf32, #tpu.memory_space<vmem>>, vector<1x32x1xf32>
    %83 = vector.shape_cast %82 : vector<1x32x1xf32> to vector<32x1xf32>
    %84 = vector.broadcast %83 : vector<32x1xf32> to vector<32x1024xf32>
    %85 = arith.addf %81, %84 : vector<32x1024xf32>
    %86 = vector.broadcast %77 : vector<32x1xf32> to vector<32x1024xf32>
    %87 = arith.addf %85, %86 : vector<32x1024xf32>
    %cst_57 = arith.constant 5.000000e-01 : f32
    %88 = vector.broadcast %cst_57 : f32 to vector<32x1024xf32>
    %89 = arith.mulf %88, %87 : vector<32x1024xf32>
    %cst_58 = arith.constant 4.471500e-02 : f32
    %90 = vector.broadcast %cst_58 : f32 to vector<32x1024xf32>
    %91 = arith.mulf %90, %87 : vector<32x1024xf32>
    %92 = arith.mulf %91, %87 : vector<32x1024xf32>
    %93 = arith.mulf %92, %87 : vector<32x1024xf32>
    %94 = arith.addf %87, %93 : vector<32x1024xf32>
    %cst_59 = arith.constant 0.797884583 : f32
    %95 = vector.broadcast %cst_59 : f32 to vector<32x1024xf32>
    %96 = arith.mulf %95, %94 : vector<32x1024xf32>
    %97 = math.tanh %96 : vector<32x1024xf32>
    %cst_60 = arith.constant 1.000000e+00 : f32
    %98 = vector.broadcast %cst_60 : f32 to vector<32x1024xf32>
    %99 = arith.addf %98, %97 : vector<32x1024xf32>
    %100 = arith.mulf %89, %99 : vector<32x1024xf32>
    %101 = arith.truncf %100 : vector<32x1024xf32> to vector<32x1024xbf16>
    %c2_61 = arith.constant 2 : index
    %c0_62 = arith.constant 0 : index
    %c0_63 = arith.constant 0 : index
    %102 = vector.load %arg7[%c2_61, %c0_62, %c0_63] : memref<3x4x32xbf16, #tpu.memory_space<vmem>>, vector<1x4x32xbf16>
    %103 = vector.shape_cast %102 : vector<1x4x32xbf16> to vector<4x32xbf16>
    %cst_64 = arith.constant dense<0.000000e+00> : vector<4x1024xf32>
    %104 = tpu.matmul %103, %101, %cst_64 {dimension_numbers = #tpu.dot_dimension_numbers<[1], [0], [0], [1], [0, 0, 1, 1], [], []>} : vector<4x32xbf16>, vector<32x1024xbf16>, vector<4x1024xf32> -> vector<4x1024xf32>
    %105 = arith.addf %74, %104 : vector<4x1024xf32>
    %c2_65 = arith.constant 2 : index
    %c0_66 = arith.constant 0 : index
    %c0_67 = arith.constant 0 : index
    %106 = vector.load %arg8[%c2_65, %c0_66, %c0_67] : memref<3x4x1xf32, #tpu.memory_space<vmem>>, vector<1x4x1xf32>
    %107 = vector.shape_cast %106 : vector<1x4x1xf32> to vector<4x1xf32>
    %108 = vector.broadcast %107 : vector<4x1xf32> to vector<4x1024xf32>
    %109 = arith.addf %105, %108 : vector<4x1024xf32>
    %c0_68 = arith.constant 0 : index
    %c0_69 = arith.constant 0 : index
    %c0_70 = arith.constant 0 : index
    %110 = vector.load %arg9[%c0_68, %c0_69, %c0_70] : memref<1x4x1024xf32, #tpu.memory_space<vmem>>, vector<1x4x1024xf32>
    %111 = vector.shape_cast %110 : vector<1x4x1024xf32> to vector<4x1024xf32>
    %112 = vector.shape_cast %109 : vector<4x1024xf32> to vector<1x4x1024xf32>
    tpu.vector_store %arg9[%c0_68, %c0_69, %c0_70], %112 {strides = array<i32>} : memref<1x4x1024xf32, #tpu.memory_space<vmem>>, vector<1x4x1024xf32>,
    return
  }
  func.func @transform_0(%arg0: i32, %arg1: i32) -> (i32, i32, i32) {
    %c0_i32 = arith.constant 0 : i32
    %c0_i32_0 = arith.constant 0 : i32
    return %arg0, %c0_i32, %arg1 : i32, i32, i32
  }
  func.func @transform_1(%arg0: i32, %arg1: i32) -> (i32, i32, i32) {
    %c0_i32 = arith.constant 0 : i32
    %c0_i32_0 = arith.constant 0 : i32
    %c0_i32_1 = arith.constant 0 : i32
    return %arg0, %c0_i32, %c0_i32_0 : i32, i32, i32
  }
  func.func @transform_2(%arg0: i32, %arg1: i32) -> (i32, i32, i32) {
    %c0_i32 = arith.constant 0 : i32
    %c0_i32_0 = arith.constant 0 : i32
    %c0_i32_1 = arith.constant 0 : i32
    %c0_i32_2 = arith.constant 0 : i32
    return %c0_i32, %c0_i32_0, %c0_i32_1 : i32, i32, i32
  }
  func.func @transform_3(%arg0: i32, %arg1: i32) -> (i32, i32, i32) {
    %c0_i32 = arith.constant 0 : i32
    %c0_i32_0 = arith.constant 0 : i32
    %c0_i32_1 = arith.constant 0 : i32
    %c0_i32_2 = arith.constant 0 : i32
    return %c0_i32, %c0_i32_0, %c0_i32_1 : i32, i32, i32
  }
  func.func @transform_4(%arg0: i32, %arg1: i32) -> (i32, i32, i32) {
    %c0_i32 = arith.constant 0 : i32
    %c0_i32_0 = arith.constant 0 : i32
    %c0_i32_1 = arith.constant 0 : i32
    %c0_i32_2 = arith.constant 0 : i32
    return %c0_i32, %c0_i32_0, %c0_i32_1 : i32, i32, i32
  }
  func.func @transform_5(%arg0: i32, %arg1: i32) -> (i32, i32, i32) {
    %c0_i32 = arith.constant 0 : i32
    %c0_i32_0 = arith.constant 0 : i32
    %c0_i32_1 = arith.constant 0 : i32
    %c0_i32_2 = arith.constant 0 : i32
    return %c0_i32, %c0_i32_0, %c0_i32_1 : i32, i32, i32
  }
  func.func @transform_6(%arg0: i32, %arg1: i32) -> (i32, i32, i32) {
    %c0_i32 = arith.constant 0 : i32
    %c0_i32_0 = arith.constant 0 : i32
    %c0_i32_1 = arith.constant 0 : i32
    %c0_i32_2 = arith.constant 0 : i32
    return %c0_i32, %c0_i32_0, %c0_i32_1 : i32, i32, i32
  }
  func.func @transform_7(%arg0: i32, %arg1: i32) -> (i32, i32, i32) {
    %c0_i32 = arith.constant 0 : i32
    %c0_i32_0 = arith.constant 0 : i32
    return %arg0, %c0_i32, %arg1 : i32, i32, i32
  }
}

</mosaic_0001>

<bundles_post_ra>
// kernel: tpu_custom_call.1
= control target key start
LH: loop header
LB: loop body
LE: loop exit
PB: predicated region body
PF: predicated region fallthrough
CT: control target
= control target key end

     0   :  { %12 = vsyncpa [#allocation3], 0  ;;  %s5384_s0 = inlined_call_operand.vmem [shape: bf16[2,4,2048], index: 0, kind: input, shape index: {}]   ;;  %s5385_s1 = inlined_call_operand.vmem [shape: f32[2,8,1], index: 1, kind: input, shape index: {}]   ;;  %s5386_s2 = inlined_call_operand.vmem [shape: bf16[3,32,4], index: 2, kind: input, shape index: {}]   ;;  %s5387_s3 = inlined_call_operand.vmem [shape: f32[3,32,1], index: 3, kind: input, shape index: {}]   ;;  %s5388_s4 = inlined_call_operand.vmem [shape: f32[3,32,8], index: 4, kind: input, shape index: {}]   ;;  %s5389_s5 = inlined_call_operand.vmem [shape: bf16[3,4,32], index: 5, kind: input, shape index: {}]   ;;  %s5390_s6 = inlined_call_operand.vmem [shape: f32[3,4,1], index: 6, kind: input, shape index: {}]   ;;  %s5391_s7 = inlined_call_operand.hbm [shape: f32[2,4,2048], index: 7, kind: output, shape index: {}]  }
   0x1   :  { %14 = vsyncpa [#allocation3 + $0x1], 0  ;;  %s3932_s24 = smov 0   ;;  %s3934_s25 = smov 0  }
   0x2   :  { %s3936_s26 = smov 0   ;;  %s3938_s27 = smov 0  }
   0x3   :  { %s3940_s28 = smov 0   ;;  %s3942_s29 = smov 0  }
   0x4   :  { %s3944_s30 = smov 0   ;;  %s3946_s8 = smov 0  }
   0x5 LB: > { %5413 = sst [smem:[#allocation5_spill]] %s3878_s29  ;;  %s3361_s9 = sadd.s32 4294967295, %s3886_s8   ;;  %s3886_s8 = sphi %s3946_s8, %s20_s8   ;;  %s3882_s30 = sphi %s3944_s30, %s5458_s30   ;;  %s3878_s29 = sphi %s3942_s29, %s5457_s29   ;;  %s3874_s28 = sphi %s3940_s28, %s5456_s28   ;;  %s3870_s27 = sphi %s3938_s27, %s5455_s27   ;;  %s3866_s26 = sphi %s3936_s26, %s5461_s26   ;;  %s3862_s25 = sphi %s3934_s25, %s5460_s25   ;;  %s3858_s24 = sphi %s3932_s24, %s5459_s24  }
   0x6   : > { %5414 = sst [smem:[#allocation6_spill]] %s3882_s30  ;;  %s3362_s10 = sadd.s32 4294967294, %s3886_s8  }
   0x7   : > { %s29_s11 = sadd.s32 1, %s3878_s29  ;;  %s32_s12 = sadd.s32 1, %s3882_s30 }
   0x8   : > { %p30_p0 = scmp.ge.s32.totalorder %s29_s11, 2  ;;  %p210_p1 = scmp.ne.s32.totalorder %s3866_s26, %s3862_s25 }
   0x9   : > { %p211_p2 = scmp.eq.s32.totalorder %s3361_s9, 3  ;;  %p216_p5 = scmp.ne.s32.totalorder %s3862_s25, %s3858_s24 }
   0xa   : > { %s5463_s11 = smov (%p30_p0, %s29_s11), 0  ;;  %s5465_s12 = smov (!%p30_p0, %s32_s12), %s3882_s30 }
   0xb   : > { %5415 = sst [smem:[#allocation7_spill]] %s5463_s11  ;;  %s196_s13 = ssub.s32 %s3878_s29, %s5463_s11 }
   0xc   : > { %p3983_p3 = por %p211_p2, %p210_p1  ;;  %p34_p4 = scmp.ge.s32.totalorder %s5465_s12, 2 }
   0xd   : > { %p217_p6 = scmp.eq.s32.totalorder %s3362_s10, 3  ;;  %p3365_p7 = scmp.ge.s32.totalorder %s3886_s8, 1 }
   0xe   : > { %s5467_s12 = smov (%p34_p4, %s5465_s12), 0  ;;  %p270_p9 = scmp.lt.s32.totalorder %s3886_s8, 5 }
   0xf   : > { %5417 = sst [smem:[#allocation8_spill]] %s5467_s12  ;;  %p3992_p8 = por %p217_p6, %p216_p5 }
  0x10   : > { %s195_s16 = ssub.s32 %s3882_s30, %s5467_s12  ;;  %s200_s17 = sadd.s32 1, %s3866_s26 }
  0x11   : > { %s197_s18 = sor.u32 %s196_s13, %s195_s16  ;;  %p271_p10 = pnand %p3365_p7, %p270_p9 }
  0x12   : > { %p198_p11 = scmp.eq.s32.totalorder %s197_s18, 0 }
  0x13   : > { %274 = sbr.rel (%p271_p10) target bundleno = 1727 (0x6bf), region = 48 }
  0x14   : > { %s4001_s19 = scalar_select %p198_p11, %s3866_s26, %s200_s17  }
  0x1a   : > { %p311_p12 = scmp.lt.s32.totalorder %s3874_s28, 1  ;;  %v333_v0 = vld [vmem:[%s5388_s4] sm:$0xff]  ;;  %vm337_vm0 = vcmask 64512   ;;  %v335_v1 = vld [vmem:[%s5388_s4 + $0x10] sm:$0xff]  ;;  %s4011_s9 = sshll.u32 %s3870_s27, 3  ;;  %v479_v2 = vlaneseq  ;;  %v5396_v6 = vmov 0  }
  0x1b   : > { %3488 = vmatprep.mubr.msk.f32.mxu0 %vm337_vm0, %v333_v0  ;;  %3491 = vmatprep.mubr.msk.f32.mxu1 %vm337_vm0, %v335_v1  ;;  %p313_p13 = scmp.lt.s32.totalorder %s4011_s9, 15  ;;  %v3888_v3 = vmov 1983009808   ;;  %v334_v7 = vld [vmem:[%s5388_s4 + $0x8] sm:$0xff]  ;;  %v439_v9 = vld [vmem:[%s5387_s3] sm:$0xff]  ;;  %v336_v10 = vld [vmem:[%s5388_s4 + $0x18] sm:$0xff] }
  0x1c   : > { %s312_s10 = scalar_select %p311_p12, %s3874_s28, 1  ;;  %v477_v4 = vunpack.c.l.s4 %v3888_v3  ;;  %v4017_v5 = vshrl.u32 %v479_v2, 7  ;;  %3586 = vset.pattern.permute.xlu0 %v5396_v6  ;;  %3587 = vset.pattern.permute.xlu1 %v5396_v6  ;;  %v442_v11 = vld [vmem:[%s5387_s3 + $0x18] sm:$0xff]  ;;  %v440_v14 = vld [vmem:[%s5387_s3 + $0x8] sm:$0xff]  ;;  %vm516_vm1 = vcmask 1041408   ;;  %v3589_v28 = vld [vmem:[%s5386_s2] sm:$0xff]  }
  0x1d   : > { %s314_s27 = scalar_select %p313_p13, %s4011_s9, 15  ;;  %445 = vperm.xlu0 %3586, %v439_v9   ;;  %460 = vperm.xlu1 %3587, %v442_v11   ;;  %v441_v29 = vld [vmem:[%s5387_s3 + $0x10] sm:$0xff]  ;;  %vm509_vm2 = vcmask 31744   ;;  %v3590_v33 = vld [vmem:[%s5386_s2 + $0x8] sm:$0xff]   ;;  %v1298_v38 = vld [vmem:[%s5390_s6] sm:$0xf] }
  0x1e   : > { %s3370_s13 = sshll.u32 %s312_s10, 3  ;;  %s3368_s18 = sshll.u32 %s312_s10, 4  ;;  %v478_v8 = vunpack.c.0.s8 %v477_v4  ;;  %v3406_v39 = vld [vmem:[%s5387_s3 + $0x28] sm:$0xff]  ;;  %v3405_v42 = vld [vmem:[%s5387_s3 + $0x20] sm:$0xff]  ;;  %v3408_v45 = vld [vmem:[%s5387_s3 + $0x38] sm:$0xff]  ;;  %vm1110_vm3 = vcmask 261120  }
  0x1f   : > { %s4031_s12 = scalar_lea.vmem %s5385_s1, %s3370_s13  ;;  %s316_s29 = sadd.s32 %s3368_s18, %s314_s27  ;;  %v3407_v50 = vld [vmem:[%s5387_s3 + $0x30] sm:$0xff] }
  0x20   : > { %v332_v12 = vld [vmem:[%s4031_s12] sm:$0xff]  ;;  %s3369_s10 = sshll.u32 %s316_s29, 1  ;;  %v481_v13 = vsub.s32 %v478_v8, %v4017_v5  ;;  %s307_s17 = sand.u32 1, %s3862_s25  }
  0x21   : > { %3486 = vmatprep.subr.mxu0 %v332_v12  ;;  %3510 = vmatprep.subr.mxu1 %v332_v12  ;;  %s4047_s27 = scalar_lea.vmem %s5384_s0, %s3369_s10  ;;  %s3366_s10 = sshll.u32 %s307_s17, 5 }
  0x22   : > { %3487 = vmatpush3.msra.mxu0 %v332_v12  ;;  %3511 = vmatpush3.msra.mxu1 %v332_v12  ;;  %v326_v15 = vld [vmem:[%s4047_s27] sm:$0xff]  ;;  %v327_v16 = vld [vmem:[%s4047_s27 + $0x8] sm:$0xff]  ;;  %s3467_s20 = sshll.u32 %s3874_s28, 4  ;;  %s3891_s22 = smov [#allocation2]  }
  0x23   : > { %3489 = vmatmul.mubr.msk.f32.vlgmr.msra.gmra.mrb[0].mxu0 %vm337_vm0, %v334_v7  ;;  %3492 = vmatmul.mubr.msk.f32.vlgmr.msra.gmra.mrb[0].mxu1 %vm337_vm0, %v336_v10  ;;  %v482_v17 = vrot.slane %v326_v15, %v481_v13  ;;  %v475_v18 = vcombine.high %v326_v15, %v326_v15  ;;  %v499_v19 = vrot.slane %v327_v16, %v481_v13  ;;  %s3266_s21 = sadd.s32 %s3467_s20, %s4011_s9  ;;  %s3254_s9 = scalar_lea.sflag [#allocation3], %s307_s17 }
  0x24   : > { %573 = vmatprep.mubr.bf16.mxu1 %v5396_v6  ;;  %626 = vmatprep.mubr.bf16.mxu0 %v5396_v6  ;;  %v492_v20 = vcombine.high %v327_v16, %v327_v16  ;;  %s3468_s30 = sshll.u32 %s3266_s21, 6  ;;  %s3796_s23 = sshll.u32 %s3891_s22, 4  ;;  %s3797_s23 = int_to_ptr.vmem [resolvable:$false] %s3796_s23 }
  0x25   : > { %v490_v21 = vcombine.high %v482_v17, %v482_v17  ;;  %v489_v22 = vrot.slane %v475_v18, %v481_v13  ;;  %v518_v23 = vsel %vm516_vm1, %v482_v17, 0  ;;  %v507_v24 = vcombine.high %v499_v19, %v499_v19  ;;  %450 = vperm.xlu0 %3586, %v440_v14   ;;  %s5329_s13 = scalar_lea.hbm %s5391_s7, %s3468_s30  ;;  %s3798_s16 = scalar_lea.vmem %s3797_s23, 1024 }
  0x26   : > { %v506_v25 = vrot.slane %v492_v20, %v481_v13  ;;  %v530_v31 = vsel %vm516_vm1, %v499_v19, 0 }
  0x27   : > { %3377 = vmatprep.subr.msk.bf16.mxu1 %vm516_vm1, %v490_v21  ;;  %v491_v26 = vcombine.high %v489_v22, %v489_v22  ;;  %v524_v27 = vsel %vm516_vm1, %v489_v22, 0 }
  0x28   : > { %542 = vmatpush1.bf16.msra.mxu1 %v518_v23  ;;  %v508_v30 = vcombine.high %v506_v25, %v506_v25  ;;  %v536_v32 = vsel %vm516_vm1, %v506_v25, 0 }
  0x29   : > { %3380 = vmatprep.subr.msk.bf16.mxu0 %vm516_vm1, %v491_v26  ;;  %3383 = vmatprep.subr.msk.bf16.mxu1 %vm516_vm1, %v507_v24 }
  0x2a   : > { %595 = vmatpush1.bf16.msra.mxu0 %v524_v27  ;;  %455 = vperm.xlu0 %3586, %v441_v29  }
  0x2b   : > { %3378 = vmatmul.mubr.msk.bf16.vlgmr.msra.gmra.mrb[4].mxu1 %vm509_vm2, %v3589_v28  ;;  %3386 = vmatprep.subr.msk.bf16.mxu0 %vm516_vm1, %v508_v30 }
  0x2c   : > { %583 = vmatprep.mubr.bf16.mxu1 %v5396_v6  ;;  %648 = vmatpush1.bf16.msra.mxu1 %v530_v31 }
  0x2d   : > { %3381 = vmatmul.mubr.msk.bf16.vlgmr.msra.gmra.mrb[4].mxu0 %vm509_vm2, %v3589_v28 }
  0x2e   : > { %636 = vmatprep.mubr.bf16.mxu0 %v5396_v6  ;;  %701 = vmatpush1.bf16.msra.mxu0 %v536_v32 }
  0x33   : > { %3379 = vmatmul.mubr.msk.bf16.gmra.mrb[8].mxu1 %vm509_vm2, %v3590_v33 }
  0x34   : > { %679 = vmatprep.mubr.bf16.mxu1 %v5396_v6 }
  0x35   : > { %3382 = vmatmul.mubr.msk.bf16.gmra.mrb[8].mxu0 %vm509_vm2, %v3590_v33 }
  0x36   : > { %732 = vmatprep.mubr.bf16.mxu0 %v5396_v6 }
  0x3b   : > { %3384 = vmatmul.mubr.msk.bf16.vlgmr.msra.gmra.mrb[12].mxu1 %vm509_vm2, %v3589_v28 }
  0x3c   : > { %689 = vmatprep.mubr.bf16.mxu1 %v5396_v6 }
  0x3d   : > { %3387 = vmatmul.mubr.msk.bf16.vlgmr.msra.gmra.mrb[12].mxu0 %vm509_vm2, %v3589_v28 }
  0x3e   : > { %742 = vmatprep.mubr.bf16.mxu0 %v5396_v6 }
  0x43   : > { %3385 = vmatmul.mubr.msk.bf16.gmra.mrb[16].mxu1 %vm509_vm2, %v3590_v33 }
  0x44   : > { %1146 = vmatprep.mubr.bf16.mxu1 %v5396_v6 }
  0x45   : > { %3388 = vmatmul.mubr.msk.bf16.gmra.mrb[16].mxu0 %vm509_vm2, %v3590_v33 }
  0x46   : > { %1187 = vmatprep.mubr.bf16.mxu0 %v5396_v6 }
  0x9c   : > { %v446_v13 = vpop.permute.xlu0 %445  ;;  %v461_v15 = vpop.permute.xlu1 %460 }
  0xa4   : > { %v451_v14 = vpop.permute.xlu0 %450 }
  0xa9   : > { %v456_v16 = vpop.permute.xlu0 %455 }
  0xf6   : > { %v3490_v34 = vpop.f32.mrb[0].mxu0  ;;  %v3493_v35 = vpop.f32.mrb[0].mxu1 }
  0xf7   : > { %v426_v36 = vpop.f32.mrb[1].mxu1  ;;  %760 = vperm.xlu1 %3587, %v3490_v34   ;;  %v416_v37 = vpop.f32.mrb[1].mxu0 }
  0xf8   : > { %765 = vperm.xlu0 %3586, %v426_v36  }
  0xfb   : > { %755 = vperm.xlu1 %3587, %v416_v37  }
  0xfc   : > { %1301 = vperm.xlu0 %3586, %v1298_v38  }
  0xfe   : > { %v575_v40 = vpop.f32.mrb[4].mxu1 }
  0xff   : > { %770 = vperm.xlu1 %3587, %v3493_v35   ;;  %v577_v41 = vpop.f32.mrb[5].mxu1  ;;  %v576_v17 = vadd.f32 %v575_v40, %v446_v13 }
 0x100   : > { %1454 = vperm.xlu0 %3586, %v3406_v39   ;;  %v628_v43 = vpop.f32.mrb[4].mxu0  ;;  %v579_v44 = vpop.f32.mrb[6].mxu1  ;;  %v578_v18 = vadd.f32 %v577_v41, %v446_v13 }
 0x101   : > { %v630_v46 = vpop.f32.mrb[5].mxu0  ;;  %v581_v47 = vpop.f32.mrb[7].mxu1  ;;  %v629_v19 = vadd.f32 %v628_v43, %v446_v13  ;;  %v580_v21 = vadd.f32 %v579_v44, %v451_v14 }
 0x102   : > { %v632_v48 = vpop.f32.mrb[6].mxu0  ;;  %v631_v20 = vadd.f32 %v630_v46, %v446_v13  ;;  %v582_v22 = vadd.f32 %v581_v47, %v451_v14 }
 0x103   : > { %1449 = vperm.xlu1 %3587, %v3405_v42   ;;  %v634_v49 = vpop.f32.mrb[7].mxu0  ;;  %v633_v23 = vadd.f32 %v632_v48, %v451_v14 }
 0x104   : > { %1464 = vperm.xlu0 %3586, %v3408_v45   ;;  %v635_v24 = vadd.f32 %v634_v49, %v451_v14 }
 0x106   : > { %v585_v51 = vpop.f32.mrb[8].mxu1 }
 0x107   : > { %1459 = vperm.xlu1 %3587, %v3407_v50   ;;  %v587_v52 = vpop.f32.mrb[9].mxu1  ;;  %v586_v25 = vadd.f32 %v585_v51, %v456_v16 }
 0x108   : > { %v638_v53 = vpop.f32.mrb[8].mxu0  ;;  %v589_v54 = vpop.f32.mrb[10].mxu1  ;;  %v588_v26 = vadd.f32 %v587_v52, %v456_v16 }
 0x109   : > { %v640_v55 = vpop.f32.mrb[9].mxu0  ;;  %v591_v56 = vpop.f32.mrb[11].mxu1  ;;  %v590_v27 = vadd.f32 %v589_v54, %v461_v15  ;;  %v639_v29 = vadd.f32 %v638_v53, %v456_v16 }
 0x10a   : > { %v642_v57 = vpop.f32.mrb[10].mxu0  ;;  %v4103_v28 = vadd.f32 %v591_v56, %v461_v15  ;;  %v641_v30 = vadd.f32 %v640_v55, %v456_v16 }
 0x10b   : > { %v644_v58 = vpop.f32.mrb[11].mxu0  ;;  %v4105_v33 = vadd.f32 %v642_v57, %v461_v15 }
 0x10c   : > { %v4107_v34 = vadd.f32 %v644_v58, %v461_v15 }
 0x10e   : > { %v681_v59 = vpop.f32.mrb[12].mxu1 }
 0x10f   : > { %v683_v60 = vpop.f32.mrb[13].mxu1  ;;  %v682_v31 = vadd.f32 %v681_v59, %v446_v13 }
 0x110   : > { %v734_v61 = vpop.f32.mrb[12].mxu0  ;;  %v685_v62 = vpop.f32.mrb[14].mxu1  ;;  %v684_v32 = vadd.f32 %v683_v60, %v446_v13 }
 0x111   : > { %v736_v63 = vpop.f32.mrb[13].mxu0  ;;  %v687_v0 = vpop.f32.mrb[15].mxu1  ;;  %v735_v35 = vadd.f32 %v734_v61, %v446_v13  ;;  %v686_v37 = vadd.f32 %v685_v62, %v451_v14 }
 0x112   : > { %v738_v1 = vpop.f32.mrb[14].mxu0  ;;  %v737_v36 = vadd.f32 %v736_v63, %v446_v13  ;;  %v688_v38 = vadd.f32 %v687_v0, %v451_v14 }
 0x113   : > { %v740_v2 = vpop.f32.mrb[15].mxu0  ;;  %v739_v40 = vadd.f32 %v738_v1, %v451_v14 }
 0x114   : > { %v741_v41 = vadd.f32 %v740_v2, %v451_v14 }
 0x116   : > { %v691_v3 = vpop.f32.mrb[16].mxu1 }
 0x117   : > { %v693_v4 = vpop.f32.mrb[17].mxu1  ;;  %v692_v42 = vadd.f32 %v691_v3, %v456_v16 }
 0x118   : > { %v744_v7 = vpop.f32.mrb[16].mxu0  ;;  %v695_v8 = vpop.f32.mrb[18].mxu1  ;;  %v694_v43 = vadd.f32 %v693_v4, %v456_v16 }
 0x119   : > { %v746_v9 = vpop.f32.mrb[17].mxu0  ;;  %v697_v10 = vpop.f32.mrb[19].mxu1  ;;  %v4109_v44 = vadd.f32 %v695_v8, %v461_v15  ;;  %v745_v45 = vadd.f32 %v744_v7, %v456_v16 }
 0x11a   : > { %v748_v11 = vpop.f32.mrb[18].mxu0  ;;  %v747_v46 = vadd.f32 %v746_v9, %v456_v16  ;;  %v4111_v47 = vadd.f32 %v697_v10, %v461_v15 }
 0x11b   : > { %v750_v12 = vpop.f32.mrb[19].mxu0  ;;  %v4113_v48 = vadd.f32 %v748_v11, %v461_v15 }
 0x11c   : > { %v4115_v49 = vadd.f32 %v750_v12, %v461_v15 }
 0x176   : > { %v761_v39 = vpop.permute.xlu1 %760 }
 0x177   : > { %v4117_v50 = vadd.f32 %v761_v39, %v580_v21  ;;  %v782_v51 = vadd.f32 %v761_v39, %v582_v22  ;;  %v766_v52 = vpop.permute.xlu0 %765  ;;  %v4119_v53 = vadd.f32 %v761_v39, %v633_v23  ;;  %v784_v54 = vadd.f32 %v761_v39, %v635_v24 }
 0x178   : > { %v4121_v55 = vadd.f32 %v761_v39, %v686_v37  ;;  %v4123_v56 = vadd.f32 %v761_v39, %v688_v38  ;;  %v4125_v58 = vadd.f32 %v761_v39, %v739_v40  ;;  %v4127_v59 = vadd.f32 %v761_v39, %v741_v41 }
 0x179   : > { %v4129_v62 = vadd.f32 %v766_v52, %v586_v25  ;;  %v4131_v63 = vadd.f32 %v766_v52, %v588_v26  ;;  %v4133_v0 = vadd.f32 %v766_v52, %v639_v29  ;;  %v4135_v1 = vadd.f32 %v766_v52, %v641_v30 }
 0x17a   : > { %v756_v57 = vpop.permute.xlu1 %755  ;;  %v4137_v2 = vadd.f32 %v766_v52, %v692_v42  ;;  %v4139_v3 = vadd.f32 %v766_v52, %v694_v43  ;;  %v4141_v4 = vadd.f32 %v766_v52, %v745_v45  ;;  %v4143_v8 = vadd.f32 %v766_v52, %v747_v46 }
 0x17b   : > { %v774_v60 = vadd.f32 %v756_v57, %v578_v18  ;;  %v776_v61 = vadd.f32 %v756_v57, %v631_v20  ;;  %v4145_v9 = vadd.f32 %v756_v57, %v576_v17  ;;  %v846_v10 = vmul.f32 0.044715, %v782_v51 }
 0x17c   : > { %v4147_v12 = vadd.f32 %v756_v57, %v629_v19  ;;  %v4149_v13 = vadd.f32 %v756_v57, %v682_v31  ;;  %v4151_v14 = vadd.f32 %v756_v57, %v684_v32  ;;  %v4153_v15 = vadd.f32 %v756_v57, %v735_v35 }
 0x17d   : > { %v838_v7 = vmul.f32 0.044715, %v774_v60  ;;  %v840_v11 = vmul.f32 0.044715, %v776_v61  ;;  %v4157_v18 = vadd.f32 %v756_v57, %v737_v36  ;;  %v4159_v20 = vmul.f32 0.5, %v774_v60 }
 0x17e   : > { %v4155_v16 = vpop.permute.xlu1 %770  ;;  %v4161_v21 = vmul.f32 0.5, %v782_v51  ;;  %v4163_v17 = vmul.f32 0.5, %v776_v61  ;;  %v878_v23 = vmul.f32 %v846_v10, %v782_v51  ;;  %v848_v19 = vmul.f32 0.044715, %v784_v54 }
 0x17f   : > { %v870_v22 = vmul.f32 %v838_v7, %v774_v60  ;;  %v872_v24 = vmul.f32 %v840_v11, %v776_v61  ;;  %v4166_v25 = vadd.f32 %v4155_v16, %v590_v27  ;;  %v4168_v26 = vmul.f32 0.5, %v784_v54 }
 0x180   : > { %v837_v29 = vmul.f32 0.044715, %v4145_v9  ;;  %v845_v30 = vmul.f32 0.044715, %v4117_v50  ;;  %v910_v32 = vmul.f32 %v878_v23, %v782_v51  ;;  %v880_v35 = vmul.f32 %v848_v19, %v784_v54 }
 0x181   : > { %v902_v31 = vmul.f32 %v870_v22, %v774_v60  ;;  %v904_v36 = vmul.f32 %v872_v24, %v776_v61  ;;  %v4174_v37 = vadd.f32 %v4155_v16, %v4103_v28  ;;  %v4178_v38 = vadd.f32 %v4155_v16, %v4105_v33 }
 0x182   : > { %v869_v27 = vmul.f32 %v837_v29, %v4145_v9  ;;  %v877_v39 = vmul.f32 %v845_v30, %v4117_v50  ;;  %v942_v41 = vadd.f32 %v910_v32, %v782_v51  ;;  %v912_v42 = vmul.f32 %v880_v35, %v784_v54 }
 0x183   : > { %v934_v40 = vadd.f32 %v902_v31, %v774_v60  ;;  %v936_v43 = vadd.f32 %v904_v36, %v776_v61  ;;  %v839_v52 = vmul.f32 0.044715, %v4147_v12  ;;  %v847_v28 = vmul.f32 0.044715, %v4119_v53 }
 0x184   : > { %v901_v45 = vmul.f32 %v869_v27, %v4145_v9  ;;  %v909_v46 = vmul.f32 %v877_v39, %v4117_v50  ;;  %v974_v7 = vmul.f32 0.7978846, %v942_v41  ;;  %v944_v33 = vadd.f32 %v912_v42, %v784_v54 }
 0x185   : > { %v966_v57 = vmul.f32 0.7978846, %v934_v40  ;;  %v968_v10 = vmul.f32 0.7978846, %v936_v43  ;;  %v871_v51 = vmul.f32 %v839_v52, %v4147_v12  ;;  %v879_v60 = vmul.f32 %v847_v28, %v4119_v53 }
 0x186   : > { %v933_v11 = vadd.f32 %v901_v45, %v4145_v9  ;;  %v941_v22 = vadd.f32 %v909_v46, %v4117_v50  ;;  %v4192_v61 = vadd.f32 %v4155_v16, %v4107_v34  ;;  %v4196_v23 = vadd.f32 %v4155_v16, %v4109_v44 }
 0x187   : > { %3596 = vtanh.f32 %v966_v57  ;;  %v976_v19 = vmul.f32 0.7978846, %v944_v33  ;;  %v903_v29 = vmul.f32 %v871_v51, %v4147_v12  ;;  %v911_v30 = vmul.f32 %v879_v60, %v4119_v53 }
 0x188   : > { %3598 = vtanh.f32 %v974_v7  ;;  %v965_v54 = vmul.f32 0.7978846, %v933_v11  ;;  %v973_v24 = vmul.f32 0.7978846, %v941_v22  ;;  %v854_v31 = vmul.f32 0.044715, %v4131_v63 }
 0x189   : > { %3600 = vtanh.f32 %v968_v10  ;;  %v862_v32 = vmul.f32 0.044715, %v4174_v37  ;;  %v4204_v34 = vadd.f32 %v4155_v16, %v4111_v47  ;;  %v4208_v44 = vadd.f32 %v4155_v16, %v4115_v49 }
 0x18a   : > { %3602 = vtanh.f32 %v976_v19  ;;  %v935_v35 = vadd.f32 %v903_v29, %v4147_v12  ;;  %v943_v36 = vadd.f32 %v911_v30, %v4119_v53  ;;  %v886_v27 = vmul.f32 %v854_v31, %v4131_v63 }
 0x18b   : > { %3604 = vtanh.f32 %v965_v54  ;;  %v894_v39 = vmul.f32 %v862_v32, %v4174_v37  ;;  %v856_v41 = vmul.f32 0.044715, %v4135_v1  ;;  %v864_v47 = vmul.f32 0.044715, %v4192_v61 }
 0x18c   : > { %3606 = vtanh.f32 %v973_v24  ;;  %v967_v40 = vmul.f32 0.7978846, %v935_v35  ;;  %v805_v42 = vmul.f32 0.5, %v4145_v9  ;;  %v975_v49 = vmul.f32 0.7978846, %v943_v36 }
 0x18d   : > { %v918_v43 = vmul.f32 %v886_v27, %v4131_v63  ;;  %v926_v45 = vmul.f32 %v894_v39, %v4174_v37  ;;  %v813_v46 = vmul.f32 0.5, %v4117_v50  ;;  %v888_v52 = vmul.f32 %v856_v41, %v4135_v1 }
 0x18e   : > { %3608 = vtanh.f32 %v967_v40  ;;  %v896_v28 = vmul.f32 %v864_v47, %v4192_v61  ;;  %v853_v33 = vmul.f32 0.044715, %v4129_v62  ;;  %v807_v9 = vmul.f32 0.5, %v4147_v12 }
 0x18f   : > { %3610 = vtanh.f32 %v975_v49  ;;  %v950_v57 = vadd.f32 %v918_v43, %v4131_v63  ;;  %v958_v7 = vadd.f32 %v926_v45, %v4174_v37  ;;  %v920_v10 = vmul.f32 %v888_v52, %v4135_v1 }
 0x190   : > { %v928_v11 = vmul.f32 %v896_v28, %v4192_v61  ;;  %v861_v50 = vmul.f32 0.044715, %v4166_v25  ;;  %v815_v51 = vmul.f32 0.5, %v4119_v53  ;;  %v885_v54 = vmul.f32 %v853_v33, %v4129_v62 }
 0x191   : > { %v3597_v22 = vpop.eup %3596  ;;  %v982_v60 = vmul.f32 0.7978846, %v950_v57  ;;  %v990_v19 = vmul.f32 0.7978846, %v958_v7  ;;  %v952_v30 = vadd.f32 %v920_v10, %v4135_v1  ;;  %v855_v27 = vmul.f32 0.044715, %v4133_v0 }
 0x192   : > { %v3599_v24 = vpop.eup %3598  ;;  %v1030_v29 = vadd.f32 1.0, %v3597_v22  ;;  %v960_v31 = vadd.f32 %v928_v11, %v4192_v61  ;;  %v893_v12 = vmul.f32 %v861_v50, %v4166_v25  ;;  %v917_v36 = vmul.f32 %v885_v54, %v4129_v62 }
 0x193   : > { %v3601_v32 = vpop.eup %3600  ;;  %v1038_v35 = vadd.f32 1.0, %v3599_v24  ;;  %3612 = vtanh.f32 %v982_v60  ;;  %v984_v41 = vmul.f32 0.7978846, %v952_v30  ;;  %v887_v30 = vmul.f32 %v855_v27, %v4133_v0 }
 0x194   : > { %v3603_v53 = vpop.eup %3602  ;;  %v1062_v39 = vmul.f32 %v1030_v29, %v4159_v20  ;;  %v1032_v40 = vadd.f32 1.0, %v3601_v32  ;;  %3614 = vtanh.f32 %v990_v19  ;;  %v992_v45 = vmul.f32 0.7978846, %v960_v31 }
 0x195   : > { %v3605_v47 = vpop.eup %3604  ;;  %v1070_v49 = vmul.f32 %v1038_v35, %v4161_v21  ;;  %v1040_v43 = vadd.f32 1.0, %v3603_v53  ;;  %v925_v52 = vmul.f32 %v893_v12, %v4166_v25  ;;  %3616 = vtanh.f32 %v984_v41 }
 0x196   : > { %v3607_v28 = vpop.eup %3606  ;;  %v1064_v57 = vmul.f32 %v1032_v40, %v4163_v17  ;;  %v1029_v7 = vadd.f32 1.0, %v3605_v47  ;;  %v949_v33 = vadd.f32 %v917_v36, %v4129_v62  ;;  %3618 = vtanh.f32 %v992_v45 }
 0x197   : > { %v1094_v10 = vpack.c.bf16 %v1070_v49, %v1062_v39  ;;  %v1072_v20 = vmul.f32 %v1040_v43, %v4168_v26  ;;  %v1037_v11 = vadd.f32 1.0, %v3607_v28  ;;  %v957_v21 = vadd.f32 %v925_v52, %v4166_v25 }
 0x198   : > { %v3609_v50 = vpop.eup %3608  ;;  %v1061_v22 = vmul.f32 %v1029_v7, %v805_v42  ;;  %v981_v60 = vmul.f32 0.7978846, %v949_v33  ;;  %v863_v19 = vmul.f32 0.044715, %v4178_v38  ;;  %v822_v35 = vmul.f32 0.5, %v4131_v63 }
 0x199   : > { %v3611_v54 = vpop.eup %3610  ;;  %1114 = vmatprep.subr.bf16.mxu1 %v1094_v10  ;;  %v1096_v24 = vpack.c.bf16 %v1072_v20, %v1064_v57  ;;  %v1069_v17 = vmul.f32 %v1037_v11, %v813_v46  ;;  %v1031_v29 = vadd.f32 1.0, %v3609_v50  ;;  %v989_v12 = vmul.f32 0.7978846, %v957_v21 }
 0x19a   : > { %v1039_v31 = vadd.f32 1.0, %v3611_v54  ;;  %3620 = vtanh.f32 %v981_v60  ;;  %v895_v26 = vmul.f32 %v863_v19, %v4178_v38  ;;  %v919_v36 = vmul.f32 %v887_v30, %v4133_v0 }
 0x19b   : > { %1155 = vmatprep.subr.bf16.mxu0 %v1096_v24  ;;  %v1093_v32 = vpack.c.bf16 %v1069_v17, %v1061_v22  ;;  %v1063_v42 = vmul.f32 %v1031_v29, %v807_v9  ;;  %v830_v39 = vmul.f32 0.5, %v4174_v37  ;;  %3622 = vtanh.f32 %v989_v12 }
 0x19c   : > { %v1071_v53 = vmul.f32 %v1039_v31, %v815_v51  ;;  %v927_v46 = vmul.f32 %v895_v26, %v4178_v38  ;;  %v824_v27 = vmul.f32 0.5, %v4135_v1  ;;  %v951_v41 = vadd.f32 %v919_v36, %v4133_v0 }
 0x19d   : > { %v3613_v40 = vpop.eup %3612  ;;  %1115 = vmatpush1.bf16.msra.mxu1 %v1093_v32  ;;  %v842_v47 = vmul.f32 0.044715, %v4151_v14  ;;  %v850_v9 = vmul.f32 0.044715, %v4123_v56  ;;  %v832_v51 = vmul.f32 0.5, %v4192_v61  ;;  %v821_v24 = vmul.f32 0.5, %v4129_v62 }
 0x19e   : > { %v3615_v49 = vpop.eup %3614  ;;  %v1095_v63 = vpack.c.bf16 %v1071_v53, %v1063_v42  ;;  %v1046_v43 = vadd.f32 1.0, %v3613_v40  ;;  %v959_v37 = vadd.f32 %v927_v46, %v4178_v38  ;;  %v983_v52 = vmul.f32 0.7978846, %v951_v41 }
 0x19f   : > { %v1054_v45 = vadd.f32 1.0, %v3615_v49  ;;  %v874_v28 = vmul.f32 %v842_v47, %v4151_v14  ;;  %v882_v57 = vmul.f32 %v850_v9, %v4123_v56  ;;  %v3617_v1 = vpop.eup %3616  ;;  %v844_v10 = vmul.f32 0.044715, %v4157_v18 }
 0x1a0   : > { %1156 = vmatpush1.bf16.msra.mxu0 %v1095_v63  ;;  %v1078_v7 = vmul.f32 %v1046_v43, %v822_v35  ;;  %v991_v33 = vmul.f32 0.7978846, %v959_v37  ;;  %v852_v20 = vmul.f32 0.044715, %v4127_v59  ;;  %v3619_v11 = vpop.eup %3618  ;;  %v1048_v22 = vadd.f32 1.0, %v3617_v1 }
 0x1a1   : > { %v1086_v50 = vmul.f32 %v1054_v45, %v830_v39  ;;  %3624 = vtanh.f32 %v983_v52  ;;  %v906_v61 = vmul.f32 %v874_v28, %v4151_v14  ;;  %v1056_v21 = vadd.f32 1.0, %v3619_v11 }
 0x1a2   : > { %3626 = vtanh.f32 %v991_v33  ;;  %v914_v60 = vmul.f32 %v882_v57, %v4123_v56  ;;  %v876_v19 = vmul.f32 %v844_v10, %v4157_v18  ;;  %v884_v29 = vmul.f32 %v852_v20, %v4127_v59 }
 0x1a3   : > { %v1102_v54 = vpack.c.bf16 %v1086_v50, %v1078_v7  ;;  %v938_v17 = vadd.f32 %v906_v61, %v4151_v14  ;;  %v1080_v31 = vmul.f32 %v1048_v22, %v824_v27  ;;  %v1088_v12 = vmul.f32 %v1056_v21, %v832_v51  ;;  %v4289_v21 = vld [vmem:[%s5389_s5] sm:$0x3] }
 0x1a4   : > { %v3621_v30 = vpop.eup %3620  ;;  %v946_v26 = vadd.f32 %v914_v60, %v4123_v56  ;;  %v908_v32 = vmul.f32 %v876_v19, %v4157_v18  ;;  %v829_v42 = vmul.f32 0.5, %v4166_v25  ;;  %v916_v53 = vmul.f32 %v884_v29, %v4127_v59 }
 0x1a5   : > { %1116 = vmatprep.subr.bf16.mxu1 %v1102_v54  ;;  %v1045_v35 = vadd.f32 1.0, %v3621_v30  ;;  %v970_v36 = vmul.f32 0.7978846, %v938_v17  ;;  %v3623_v62 = vpop.eup %3622  ;;  %v1104_v39 = vpack.c.bf16 %v1088_v12, %v1080_v31  ;;  %v841_v27 = vmul.f32 0.044715, %v4149_v13 }
 0x1a6   : > { %v978_v46 = vmul.f32 0.7978846, %v946_v26  ;;  %v940_v40 = vadd.f32 %v908_v32, %v4157_v18  ;;  %v1053_v41 = vadd.f32 1.0, %v3623_v62  ;;  %v823_v47 = vmul.f32 0.5, %v4133_v0 }
 0x1a7   : > { %3628 = vtanh.f32 %v970_v36  ;;  %v948_v9 = vadd.f32 %v916_v53, %v4127_v59  ;;  %1157 = vmatprep.subr.bf16.mxu0 %v1104_v39  ;;  %v849_v49 = vmul.f32 0.044715, %v4121_v55  ;;  %v873_v63 = vmul.f32 %v841_v27, %v4149_v13 }
 0x1a8   : > { %3630 = vtanh.f32 %v978_v46  ;;  %v972_v25 = vmul.f32 0.7978846, %v940_v40  ;;  %v1077_v43 = vmul.f32 %v1045_v35, %v821_v24  ;;  %v1085_v51 = vmul.f32 %v1053_v41, %v829_v42 }
 0x1a9   : > { %v831_v37 = vmul.f32 0.5, %v4178_v38  ;;  %v980_v45 = vmul.f32 0.7978846, %v948_v9  ;;  %v881_v52 = vmul.f32 %v849_v49, %v4121_v55  ;;  %v905_v0 = vmul.f32 %v873_v63, %v4149_v13 }
 0x1aa   : > { %3632 = vtanh.f32 %v972_v25  ;;  %v843_v28 = vmul.f32 0.044715, %v4153_v15  ;;  %v1101_v1 = vpack.c.bf16 %v1085_v51, %v1077_v43  ;;  %v810_v7 = vmul.f32 0.5, %v4151_v14 }
 0x1ab   : > { %v3625_v57 = vpop.eup %3624  ;;  %3634 = vtanh.f32 %v980_v45  ;;  %v851_v33 = vmul.f32 0.044715, %v4125_v58  ;;  %v913_v11 = vmul.f32 %v881_v52, %v4121_v55  ;;  %v937_v38 = vadd.f32 %v905_v0, %v4149_v13 }
 0x1ac   : > { %v3627_v10 = vpop.eup %3626  ;;  %v1047_v20 = vadd.f32 1.0, %v3625_v57  ;;  %v875_v50 = vmul.f32 %v843_v28, %v4153_v15  ;;  %1117 = vmatpush1.bf16.msra.mxu1 %v1101_v1  ;;  %v818_v61 = vmul.f32 0.5, %v4123_v56  ;;  %v858_v60 = vmul.f32 0.044715, %v4139_v3 }
 0x1ad   : > { %v1055_v22 = vadd.f32 1.0, %v3627_v10  ;;  %v883_v14 = vmul.f32 %v851_v33, %v4125_v58  ;;  %v945_v54 = vadd.f32 %v913_v11, %v4121_v55  ;;  %v969_v24 = vmul.f32 0.7978846, %v937_v38 }
 0x1ae   : > { %v1079_v19 = vmul.f32 %v1047_v20, %v823_v47  ;;  %v907_v17 = vmul.f32 %v875_v50, %v4153_v15  ;;  %v866_v56 = vmul.f32 0.044715, %v4204_v34  ;;  %v890_v31 = vmul.f32 %v858_v60, %v4139_v3 }
 0x1af   : > { %v1087_v29 = vmul.f32 %v1055_v22, %v831_v37  ;;  %v915_v30 = vmul.f32 %v883_v14, %v4125_v58  ;;  %v812_v12 = vmul.f32 0.5, %v4157_v18  ;;  %3389 = vmatmul.mubr.msk.bf16.vlgmr.msra.gmra.mrb[20].mxu1 %vm1110_vm3, %v4289_v21  ;;  %v977_v26 = vmul.f32 0.7978846, %v945_v54 }
 0x1b0   : > { %3636 = vtanh.f32 %v969_v24  ;;  %v939_v32 = vadd.f32 %v907_v17, %v4153_v15  ;;  %v898_v53 = vmul.f32 %v866_v56, %v4204_v34  ;;  %v922_v62 = vmul.f32 %v890_v31, %v4139_v3  ;;  %1228 = vmatprep.mubr.bf16.mxu1 %v5396_v6 }
 0x1b1   : > { %v3629_v42 = vpop.eup %3628  ;;  %v1103_v35 = vpack.c.bf16 %v1087_v29, %v1079_v19  ;;  %v947_v36 = vadd.f32 %v915_v30, %v4125_v58  ;;  %v820_v18 = vmul.f32 0.5, %v4127_v59  ;;  %3638 = vtanh.f32 %v977_v26 }
 0x1b2   : > { %v3631_v39 = vpop.eup %3630  ;;  %v1034_v46 = vadd.f32 1.0, %v3629_v42  ;;  %v971_v40 = vmul.f32 0.7978846, %v939_v32  ;;  %v930_v47 = vmul.f32 %v898_v53, %v4204_v34  ;;  %v954_v9 = vadd.f32 %v922_v62, %v4139_v3 }
 0x1b3   : > { %1158 = vmatpush1.bf16.msra.mxu0 %v1103_v35  ;;  %v1042_v27 = vadd.f32 1.0, %v3631_v39  ;;  %v979_v41 = vmul.f32 0.7978846, %v947_v36  ;;  %v860_v63 = vmul.f32 0.044715, %v4143_v8  ;;  %v4318_v1 = vadd.f32 %v4155_v16, %v4113_v48 }
 0x1b4   : > { %v3633_v25 = vpop.eup %3632  ;;  %v1066_v49 = vmul.f32 %v1034_v46, %v810_v7  ;;  %3640 = vtanh.f32 %v971_v40  ;;  %v868_v43 = vmul.f32 0.044715, %v4208_v44  ;;  %v962_v59 = vadd.f32 %v930_v47, %v4204_v34 }
 0x1b5   : > { %v3635_v51 = vpop.eup %3634  ;;  %v1074_v37 = vmul.f32 %v1042_v27, %v818_v61  ;;  %v1036_v45 = vadd.f32 1.0, %v3633_v25  ;;  %3642 = vtanh.f32 %v979_v41  ;;  %v986_v0 = vmul.f32 0.7978846, %v954_v9 }
 0x1b6   : > { %v1044_v52 = vadd.f32 1.0, %v3635_v51  ;;  %3390 = vmatmul.mubr.msk.bf16.vlgmr.msra.gmra.mrb[20].mxu0 %vm1110_vm3, %v4289_v21  ;;  %v892_v28 = vmul.f32 %v860_v63, %v4143_v8  ;;  %v900_v57 = vmul.f32 %v868_v43, %v4208_v44  ;;  %v994_v10 = vmul.f32 0.7978846, %v962_v59 }
 0x1b7   : > { %v1098_v7 = vpack.c.bf16 %v1074_v37, %v1066_v49  ;;  %v1068_v33 = vmul.f32 %v1036_v45, %v812_v12  ;;  %1269 = vmatprep.mubr.bf16.mxu0 %v5396_v6  ;;  %3644 = vtanh.f32 %v986_v0  ;;  %v809_v50 = vmul.f32 0.5, %v4149_v13 }
 0x1b8   : > { %v1076_v20 = vmul.f32 %v1044_v52, %v820_v18  ;;  %v924_v11 = vmul.f32 %v892_v28, %v4143_v8  ;;  %v932_v38 = vmul.f32 %v900_v57, %v4208_v44  ;;  %3646 = vtanh.f32 %v994_v10 }
 0x1b9   : > { %1196 = vmatprep.subr.bf16.mxu1 %v1098_v7  ;;  %v857_v22 = vmul.f32 0.044715, %v4137_v2  ;;  %v865_v48 = vmul.f32 0.044715, %v4196_v23  ;;  %v817_v14 = vmul.f32 0.5, %v4121_v55  ;;  %v811_v24 = vmul.f32 0.5, %v4153_v15 }
 0x1ba   : > { %v3637_v16 = vpop.eup %3636  ;;  %v1100_v61 = vpack.c.bf16 %v1076_v20, %v1068_v33  ;;  %v956_v60 = vadd.f32 %v924_v11, %v4143_v8  ;;  %v964_v19 = vadd.f32 %v932_v38, %v4208_v44  ;;  %v859_v31 = vmul.f32 0.044715, %v4141_v4 }
 0x1bb   : > { %v1033_v54 = vadd.f32 1.0, %v3637_v16  ;;  %v889_v17 = vmul.f32 %v857_v22, %v4137_v2  ;;  %v897_v13 = vmul.f32 %v865_v48, %v4196_v23  ;;  %v3639_v29 = vpop.eup %3638  ;;  %v819_v35 = vmul.f32 0.5, %v4125_v58 }
 0x1bc   : > { %1237 = vmatprep.subr.bf16.mxu0 %v1100_v61  ;;  %v988_v30 = vmul.f32 0.7978846, %v956_v60  ;;  %v996_v56 = vmul.f32 0.7978846, %v964_v19  ;;  %v1041_v12 = vadd.f32 1.0, %v3639_v29  ;;  %v891_v36 = vmul.f32 %v859_v31, %v4141_v4 }
 0x1bd   : > { %v1065_v26 = vmul.f32 %v1033_v54, %v809_v50  ;;  %v921_v55 = vmul.f32 %v889_v17, %v4137_v2  ;;  %v929_v32 = vmul.f32 %v897_v13, %v4196_v23  ;;  %v867_v15 = vmul.f32 0.044715, %v4318_v1 }
 0x1be   : > { %v3641_v42 = vpop.eup %3640  ;;  %3648 = vtanh.f32 %v988_v30  ;;  %v1073_v62 = vmul.f32 %v1041_v12, %v817_v14  ;;  %v923_v41 = vmul.f32 %v891_v36, %v4141_v4  ;;  %v826_v45 = vmul.f32 0.5, %v4139_v3 }
 0x1bf   : > { %v3643_v53 = vpop.eup %3642  ;;  %v1035_v39 = vadd.f32 1.0, %v3641_v42  ;;  %3650 = vtanh.f32 %v996_v56  ;;  %v953_v46 = vadd.f32 %v921_v55, %v4137_v2  ;;  %v961_v40 = vadd.f32 %v929_v32, %v4196_v23 }
 0x1c0   : > { %v1043_v18 = vadd.f32 1.0, %v3643_v53  ;;  %v899_v27 = vmul.f32 %v867_v15, %v4318_v1  ;;  %v1097_v47 = vpack.c.bf16 %v1073_v62, %v1065_v26  ;;  %v955_v51 = vadd.f32 %v923_v41, %v4141_v4  ;;  %v3396_v15 = vld [vmem:[%s5388_s4 + $0x38] sm:$0xff] }
 0x1c1   : > { %v1067_v58 = vmul.f32 %v1035_v39, %v811_v24  ;;  %v985_v9 = vmul.f32 0.7978846, %v953_v46  ;;  %v3645_v25 = vpop.eup %3644  ;;  %v993_v63 = vmul.f32 0.7978846, %v961_v40  ;;  %v834_v59 = vmul.f32 0.5, %v4204_v34  ;;  %v3789_v46 = vld [vmem:[%s4047_s27] sm:$0xff]  ;;  %v1302_v40 = vpop.permute.xlu0 %1301 }
 0x1c2   : > { %v1075_v49 = vmul.f32 %v1043_v18, %v819_v35  ;;  %v931_v43 = vmul.f32 %v899_v27, %v4318_v1  ;;  %v3647_v37 = vpop.eup %3646  ;;  %1197 = vmatpush1.bf16.msra.mxu1 %v1097_v47  ;;  %v1050_v52 = vadd.f32 1.0, %v3645_v25  ;;  %v987_v7 = vmul.f32 0.7978846, %v955_v51 }
 0x1c3   : > { %3652 = vtanh.f32 %v985_v9  ;;  %v1058_v28 = vadd.f32 1.0, %v3647_v37  ;;  %v828_v34 = vmul.f32 0.5, %v4143_v8  ;;  %v836_v22 = vmul.f32 0.5, %v4208_v44 }
 0x1c4   : > { %v1099_v0 = vpack.c.bf16 %v1075_v49, %v1067_v58  ;;  %3654 = vtanh.f32 %v993_v63  ;;  %v963_v57 = vadd.f32 %v931_v43, %v4318_v1  ;;  %v1082_v33 = vmul.f32 %v1050_v52, %v826_v45 }
 0x1c5   : > { %v1090_v10 = vmul.f32 %v1058_v28, %v834_v59  ;;  %3656 = vtanh.f32 %v987_v7  ;;  %v825_v24 = vmul.f32 0.5, %v4137_v2  ;;  %v833_v17 = vmul.f32 0.5, %v4196_v23  ;;  %v3788_v2 = vld [vmem:[%s4031_s12] sm:$0xff] }
 0x1c6   : > { %1238 = vmatpush1.bf16.msra.mxu0 %v1099_v0  ;;  %v995_v20 = vmul.f32 0.7978846, %v963_v57  ;;  %v827_v12 = vmul.f32 0.5, %v4141_v4  ;;  %v835_v26 = vmul.f32 0.5, %v4318_v1  ;;  %v3393_v23 = vld [vmem:[%s5388_s4 + $0x20] sm:$0xff]  ;;  %v3394_v4 = vld [vmem:[%s5388_s4 + $0x28] sm:$0xff]  ;;  %v328_v18 = vunpack.c.l.bf16 %v3789_v46 }
 0x1c7   : > { %v1106_v38 = vpack.c.bf16 %v1090_v10, %v1082_v33  ;;  %v3395_v1 = vld [vmem:[%s5388_s4 + $0x30] sm:$0xff]  ;;  %v329_v43 = vunpack.c.h.bf16 %v3789_v46  ;;  %v4451_v46 = vpop.permute.xlu1 %1449 }
 0x1c8   : > { %v3649_v11 = vpop.eup %3648  ;;  %3658 = vtanh.f32 %v995_v20  ;;  %v3592_v33 = vld [vmem:[%s5386_s2 + $0x10] sm:$0xff]  }
 0x1c9   : > { %v3651_v50 = vpop.eup %3650  ;;  %v1052_v3 = vadd.f32 1.0, %v3649_v11  ;;  %1198 = vmatprep.subr.bf16.mxu1 %v1106_v38 }
 0x1ca   : > { %v1060_v48 = vadd.f32 1.0, %v3651_v50  ;;  %v3593_v50 = vld [vmem:[%s5386_s2 + $0x18] sm:$0xff]  }
 0x1cb   : > { %v1084_v16 = vmul.f32 %v1052_v3, %v828_v34  ;;  %v3790_v34 = vld [vmem:[%s4047_s27 + $0x8] sm:$0xff] }
 0x1cc   : > { %v1092_v61 = vmul.f32 %v1060_v48, %v836_v22  ;;  %v330_v22 = vunpack.c.l.bf16 %v3790_v34 }
 0x1cd   : > { %v3653_v14 = vpop.eup %3652 }
 0x1ce   : > { %v3655_v60 = vpop.eup %3654  ;;  %v1108_v19 = vpack.c.bf16 %v1092_v61, %v1084_v16  ;;  %v1049_v54 = vadd.f32 1.0, %v3653_v14 }
 0x1cf   : > { %v1057_v13 = vadd.f32 1.0, %v3655_v60  ;;  %v3657_v29 = vpop.eup %3656 }
 0x1d0   : > { %1239 = vmatprep.subr.bf16.mxu0 %v1108_v19  ;;  %v1081_v30 = vmul.f32 %v1049_v54, %v825_v24  ;;  %v1051_v31 = vadd.f32 1.0, %v3657_v29  ;;  %v331_v54 = vunpack.c.h.bf16 %v3790_v34 }
 0x1d1   : > { %v1089_v56 = vmul.f32 %v1057_v13, %v833_v17 }
 0x1d2   : > { %v3659_v8 = vpop.eup %3658  ;;  %v1083_v32 = vmul.f32 %v1051_v31, %v827_v12 }
 0x1d3   : > { %v1105_v44 = vpack.c.bf16 %v1089_v56, %v1081_v30  ;;  %v1059_v55 = vadd.f32 1.0, %v3659_v8 }
 0x1d5   : > { %1199 = vmatpush1.bf16.msra.mxu1 %v1105_v44  ;;  %v1091_v42 = vmul.f32 %v1059_v55, %v835_v26 }
 0x1d6   : > { %3494 = vmatprep.subr.mxu1 %v3788_v2 }
 0x1d7   : > { %v1107_v35 = vpack.c.bf16 %v1091_v42, %v1083_v32 }
 0x1d8   : > { %3391 = vmatmul.mubr.msk.bf16.vlgmr.msra.gmra.mrb[24].mxu1 %vm1110_vm3, %v4289_v21 }
 0x1d9   : > { %1240 = vmatpush1.bf16.msra.mxu0 %v1107_v35  ;;  %3495 = vmatpush3.msra.mxu1 %v3788_v2 }
 0x1da   : > { %3496 = vmatprep.mubr.msk.f32.mxu1 %vm337_vm0, %v3393_v23 }
 0x1dc   : > { %3392 = vmatmul.mubr.msk.bf16.vlgmr.msra.gmra.mrb[24].mxu0 %vm1110_vm3, %v4289_v21  ;;  %v3890_v21 = vmov 839922192  }
 0x1dd   : > { %1539 = vmatprep.mubr.bf16.mxu0 %v5396_v6  ;;  %v1304_v36 = vunpack.c.l.s4 %v3890_v21 }
 0x1df   : > { %v1305_v53 = vunpack.c.0.s8 %v1304_v36  ;;  %v3443_v36 = vld [vmem:[%s5387_s3 + $0x50] sm:$0xff] }
 0x1e0   : > { %3497 = vmatmul.mubr.msk.f32.vlgmr.msra.gmra.mrb[2].mxu1 %vm337_vm0, %v3394_v4 }
 0x1e1   : > { %3499 = vmatprep.mubr.msk.f32.mxu1 %vm337_vm0, %v3395_v1  ;;  %v4377_v62 = vsub.s32 %v1305_v53, %v4017_v5  ;;  %v3441_v1 = vld [vmem:[%s5387_s3 + $0x40] sm:$0xff]  ;;  %v3442_v53 = vld [vmem:[%s5387_s3 + $0x48] sm:$0xff] }
 0x1e3   : > { %5419 = vst [vmem:[#allocation9_spill] sm:$0xff] %v4377_v62  ;;  %v1309_v9 = vrot.slane %v1302_v40, %v4377_v62  ;;  %v4455_v40 = vpop.permute.xlu1 %1459 }
 0x1e4   : > { %3500 = vmatmul.mubr.msk.f32.gmra.mrb[28].mxu1 %vm337_vm0, %v3396_v15  ;;  %v3428_v15 = vld [vmem:[%s5390_s6 + $0x4] sm:$0xf] }
 0x1e5   : > { %1592 = vmatprep.mubr.bf16.mxu1 %v5396_v6 }
 0x282   : > { %v1148_v39 = vpop.f32.mrb[20].mxu1 }
 0x283   : > { %v1150_v27 = vpop.f32.mrb[21].mxu1 }
 0x284   : > { %v1286_v41 = vcombine.low %v1148_v39, %v1150_v27  ;;  %v1152_v47 = vpop.f32.mrb[22].mxu1  ;;  %v3444_v39 = vld [vmem:[%s5387_s3 + $0x58] sm:$0xff] }
 0x285   : > { %v1153_v58 = vpop.f32.mrb[23].mxu1 }
 0x286   : > { %v1294_v25 = vadd.f32 %v1286_v41, %v328_v18  ;;  %v4453_v18 = vpop.permute.xlu0 %1454 }
 0x288   : > { %v4381_v63 = vadd.f32 %v1309_v9, %v1294_v25 }
 0x289   : > { %v1189_v49 = vpop.f32.mrb[20].mxu0 }
 0x28a   : > { %v1191_v51 = vpop.f32.mrb[21].mxu0  ;;  %v1426_v5 = vcombine.high %v4381_v63, %v4381_v63  ;;  %v1434_v59 = vpack.c.bf16 %v4381_v63, %v4381_v63  ;;  %v4457_v27 = vpop.permute.xlu0 %1464 }
 0x28b   : > { %v1287_v37 = vcombine.low %v1189_v49, %v1191_v51  ;;  %v1193_v45 = vpop.f32.mrb[22].mxu0 }
 0x28c   : > { %v1194_v52 = vpop.f32.mrb[23].mxu0  ;;  %v1435_v28 = vpack.c.bf16 %v1426_v5, %v1426_v5  ;;  %v1484_v7 = vsel %vm516_vm1, %v1434_v59, 0 }
 0x28d   : > { %v1295_v0 = vadd.f32 %v1287_v37, %v329_v43 }
 0x28e   : > { %3411 = vmatprep.subr.msk.bf16.mxu0 %vm516_vm1, %v1435_v28 }
 0x28f   : > { %v4387_v57 = vadd.f32 %v1309_v9, %v1295_v0  ;;  %1508 = vmatpush1.bf16.msra.mxu0 %v1484_v7 }
 0x291   : > { %5420 = vst [vmem:[#allocation10_spill] sm:$0xff] %v4387_v57  ;;  %v1427_v10 = vcombine.high %v4387_v57, %v4387_v57  ;;  %v1436_v20 = vpack.c.bf16 %v4387_v57, %v4387_v57 }
 0x292   : > { %3412 = vmatmul.mubr.msk.bf16.vlgmr.msra.gmra.mrb[28].mxu0 %vm509_vm2, %v3592_v33 }
 0x293   : > { %v1437_v11 = vpack.c.bf16 %v1427_v10, %v1427_v10  ;;  %1549 = vmatprep.mubr.bf16.mxu0 %v5396_v6  ;;  %v1490_v38 = vsel %vm516_vm1, %v1436_v20, 0 }
 0x295   : > { %3414 = vmatprep.subr.msk.bf16.mxu1 %vm516_vm1, %v1437_v11 }
 0x296   : > { %1561 = vmatpush1.bf16.msra.mxu1 %v1490_v38 }
 0x299   : > { %3415 = vmatmul.mubr.msk.bf16.vlgmr.msra.gmra.mrb[32].mxu1 %vm509_vm2, %v3592_v33 }
 0x29a   : > { %1602 = vmatprep.mubr.bf16.mxu1 %v5396_v6  ;;  %3413 = vmatmul.mubr.msk.bf16.gmra.mrb[32].mxu0 %vm509_vm2, %v3593_v50 }
 0x29b   : > { %1645 = vmatprep.mubr.bf16.mxu0 %v5396_v6 }
 0x2a1   : > { %3416 = vmatmul.mubr.msk.bf16.gmra.mrb[36].mxu1 %vm509_vm2, %v3593_v50 }
 0x2a2   : > { %1698 = vmatprep.mubr.bf16.mxu1 %v5396_v6 }
 0x2ab   : > { %v1230_v3 = vpop.f32.mrb[24].mxu1 }
 0x2ac   : > { %v1232_v48 = vpop.f32.mrb[25].mxu1 }
 0x2ad   : > { %v1288_v16 = vcombine.low %v1230_v3, %v1232_v48  ;;  %v1234_v61 = vpop.f32.mrb[26].mxu1 }
 0x2ae   : > { %v1235_v14 = vpop.f32.mrb[27].mxu1 }
 0x2af   : > { %v1271_v60 = vpop.f32.mrb[24].mxu0  ;;  %v1296_v19 = vadd.f32 %v1288_v16, %v330_v22 }
 0x2b0   : > { %v1273_v24 = vpop.f32.mrb[25].mxu0 }
 0x2b1   : > { %v4412_v17 = vadd.f32 %v1309_v9, %v1296_v19  ;;  %v1289_v13 = vcombine.low %v1271_v60, %v1273_v24  ;;  %v1275_v29 = vpop.f32.mrb[26].mxu0 }
 0x2b2   : > { %v1276_v30 = vpop.f32.mrb[27].mxu0 }
 0x2b3   : > { %5421 = vst [vmem:[#allocation11_spill] sm:$0xff] %v4412_v17  ;;  %v1297_v56 = vadd.f32 %v1289_v13, %v331_v54  ;;  %v3498_v8 = vpop.f32.mrb[2].mxu1  ;;  %v1428_v31 = vcombine.high %v4412_v17, %v4412_v17  ;;  %v1438_v44 = vpack.c.bf16 %v4412_v17, %v4412_v17 }
 0x2b4   : > { %1726 = vperm.xlu0 %3586, %v3498_v8   ;;  %v1398_v12 = vpop.f32.mrb[3].mxu1 }
 0x2b5   : > { %v4418_v26 = vadd.f32 %v1309_v9, %v1297_v56  ;;  %1721 = vperm.xlu1 %3587, %v1398_v12   ;;  %v1439_v55 = vpack.c.bf16 %v1428_v31, %v1428_v31  ;;  %v1496_v2 = vsel %vm516_vm1, %v1438_v44, 0 }
 0x2b7   : > { %5422 = vst [vmem:[#allocation12_spill] sm:$0xff] %v4418_v26  ;;  %v3501_v32 = vpop.f32.mrb[28].mxu1  ;;  %3417 = vmatprep.subr.msk.bf16.mxu0 %vm516_vm1, %v1439_v55  ;;  %v1429_v42 = vcombine.high %v4418_v26, %v4418_v26  ;;  %v1440_v35 = vpack.c.bf16 %v4418_v26, %v4418_v26 }
 0x2b8   : > { %1736 = vperm.xlu0 %3586, %v3501_v32   ;;  %v1408_v23 = vpop.f32.mrb[29].mxu1  ;;  %1614 = vmatpush1.bf16.msra.mxu0 %v1496_v2 }
 0x2b9   : > { %v1441_v4 = vpack.c.bf16 %v1429_v42, %v1429_v42  ;;  %1731 = vperm.xlu1 %3587, %v1408_v23   ;;  %v1502_v21 = vsel %vm516_vm1, %v1440_v35, 0 }
 0x2bb   : > { %3420 = vmatprep.subr.msk.bf16.mxu1 %vm516_vm1, %v1441_v4  ;;  %3418 = vmatmul.mubr.msk.bf16.vlgmr.msra.gmra.mrb[36].mxu0 %vm509_vm2, %v3592_v33 }
 0x2bc   : > { %1667 = vmatpush1.bf16.msra.mxu1 %v1502_v21  ;;  %2416 = vperm.xlu0 %3586, %v3441_v1  }
 0x2bd   : > { %2268 = vperm.xlu1 %3587, %v3428_v15   ;;  %1655 = vmatprep.mubr.bf16.mxu0 %v5396_v6 }
 0x2bf   : > { %3421 = vmatmul.mubr.msk.bf16.vlgmr.msra.gmra.mrb[40].mxu1 %vm509_vm2, %v3592_v33 }
 0x2c0   : > { %2426 = vperm.xlu0 %3586, %v3443_v36   ;;  %1708 = vmatprep.mubr.bf16.mxu1 %v5396_v6 }
 0x2c1   : > { %2421 = vperm.xlu1 %3587, %v3442_v53  }
 0x2c3   : > { %3419 = vmatmul.mubr.msk.bf16.gmra.mrb[40].mxu0 %vm509_vm2, %v3593_v50 }
 0x2c4   : > { %2112 = vmatprep.mubr.bf16.mxu0 %v5396_v6 }
 0x2c5   : > { %2431 = vperm.xlu1 %3587, %v3444_v39  }
 0x2c7   : > { %3422 = vmatmul.mubr.msk.bf16.gmra.mrb[44].mxu1 %vm509_vm2, %v3593_v50 }
 0x2c8   : > { %2153 = vmatprep.mubr.bf16.mxu1 %v5396_v6 }
 0x333   : > { %v4464_v37 = vpop.permute.xlu0 %1726 }
 0x334   : > { %v4460_v9 = vpop.permute.xlu1 %1721 }
 0x337   : > { %v4510_v1 = vpop.permute.xlu0 %1736 }
 0x338   : > { %v4492_v31 = vpop.permute.xlu1 %1731 }
 0x365   : > { %v1541_v41 = vpop.f32.mrb[28].mxu0 }
 0x366   : > { %v1542_v47 = vadd.f32 %v1541_v41, %v4451_v46  ;;  %v1543_v58 = vpop.f32.mrb[29].mxu0 }
 0x367   : > { %v1545_v25 = vpop.f32.mrb[30].mxu0  ;;  %v1544_v45 = vadd.f32 %v1543_v58, %v4451_v46 }
 0x368   : > { %v1739_v49 = vadd.f32 %v4460_v9, %v1542_v47  ;;  %v1546_v43 = vadd.f32 %v1545_v25, %v4453_v18  ;;  %v1547_v51 = vpop.f32.mrb[31].mxu0 }
 0x369   : > { %v1548_v52 = vadd.f32 %v1547_v51, %v4453_v18  ;;  %v4474_v10 = vadd.f32 %v4460_v9, %v1544_v45 }
 0x36a   : > { %v1803_v5 = vmul.f32 0.044715, %v1739_v49  ;;  %v4468_v59 = vadd.f32 %v4464_v37, %v1546_v43  ;;  %v4498_v32 = vmul.f32 0.5, %v1739_v49 }
 0x36b   : > { %v4480_v3 = vadd.f32 %v4464_v37, %v1548_v52  ;;  %v1804_v13 = vmul.f32 0.044715, %v4474_v10  ;;  %v4518_v39 = vmul.f32 0.5, %v4474_v10 }
 0x36c   : > { %v1594_v0 = vpop.f32.mrb[32].mxu1  ;;  %v1811_v33 = vmul.f32 0.044715, %v4468_v59  ;;  %v1835_v38 = vmul.f32 %v1803_v5, %v1739_v49 }
 0x36d   : > { %v1595_v28 = vadd.f32 %v1594_v0, %v4451_v46  ;;  %v1596_v7 = vpop.f32.mrb[33].mxu1  ;;  %v1551_v11 = vpop.f32.mrb[32].mxu0  ;;  %v1812_v56 = vmul.f32 0.044715, %v4480_v3  ;;  %v1836_v21 = vmul.f32 %v1804_v13, %v4474_v10 }
 0x36e   : > { %v1598_v20 = vpop.f32.mrb[34].mxu1  ;;  %v1553_v22 = vpop.f32.mrb[33].mxu0  ;;  %v1597_v48 = vadd.f32 %v1596_v7, %v4451_v46  ;;  %v1843_v16 = vmul.f32 %v1811_v33, %v4468_v59  ;;  %v1552_v19 = vadd.f32 %v1551_v11, %v4455_v40  ;;  %v1867_v30 = vmul.f32 %v1835_v38, %v1739_v49 }
 0x36f   : > { %v4477_v50 = vadd.f32 %v4460_v9, %v1595_v28  ;;  %v1600_v34 = vpop.f32.mrb[35].mxu1  ;;  %v1555_v61 = vpop.f32.mrb[34].mxu0  ;;  %v1599_v14 = vadd.f32 %v1598_v20, %v4453_v18  ;;  %v1554_v29 = vadd.f32 %v1553_v22, %v4455_v40  ;;  %v1844_v47 = vmul.f32 %v1812_v56, %v4480_v3 }
 0x370   : > { %v1601_v60 = vadd.f32 %v1600_v34, %v4453_v18  ;;  %v1557_v54 = vpop.f32.mrb[35].mxu0  ;;  %v1556_v8 = vadd.f32 %v1555_v61, %v4457_v27  ;;  %v4495_v44 = vadd.f32 %v4460_v9, %v1597_v48  ;;  %v1875_v12 = vmul.f32 %v1843_v16, %v4468_v59 }
 0x371   : > { %v1805_v24 = vmul.f32 0.044715, %v4477_v50  ;;  %v4501_v42 = vadd.f32 %v4464_v37, %v1599_v14  ;;  %v4507_v35 = vadd.f32 %v4492_v31, %v1552_v19  ;;  %v4515_v36 = vadd.f32 %v4492_v31, %v1554_v29 }
 0x372   : > { %v4504_v2 = vadd.f32 %v4464_v37, %v1601_v60  ;;  %v1899_v41 = vadd.f32 %v1867_v30, %v1739_v49  ;;  %v4523_v25 = vadd.f32 %v4510_v1, %v1556_v8  ;;  %v1806_v51 = vmul.f32 0.044715, %v4495_v44 }
 0x373   : > { %v1837_v15 = vmul.f32 %v1805_v24, %v4477_v50  ;;  %v1907_v45 = vadd.f32 %v1875_v12, %v4468_v59  ;;  %v1813_v0 = vmul.f32 0.044715, %v4501_v42  ;;  %v1819_v28 = vmul.f32 0.044715, %v4507_v35 }
 0x374   : > { %v1604_v55 = vpop.f32.mrb[36].mxu1  ;;  %v1814_v49 = vmul.f32 0.044715, %v4504_v2  ;;  %v1558_v7 = vadd.f32 %v1557_v54, %v4457_v27  ;;  %v1820_v20 = vmul.f32 0.044715, %v4515_v36  ;;  %v1868_v16 = vmul.f32 %v1836_v21, %v4474_v10 }
 0x375   : > { %v1605_v23 = vadd.f32 %v1604_v55, %v4455_v40  ;;  %v1606_v4 = vpop.f32.mrb[37].mxu1  ;;  %v1869_v33 = vmul.f32 %v1837_v15, %v4477_v50  ;;  %v1827_v22 = vmul.f32 0.044715, %v4523_v25  ;;  %v1838_v61 = vmul.f32 %v1806_v51, %v4495_v44 }
 0x376   : > { %v1608_v53 = vpop.f32.mrb[38].mxu1  ;;  %v1607_v58 = vadd.f32 %v1606_v4, %v4455_v40  ;;  %v4546_v48 = vadd.f32 %v4510_v1, %v1558_v7  ;;  %v1876_v19 = vmul.f32 %v1844_v47, %v4480_v3  ;;  %v1845_v54 = vmul.f32 %v1813_v0, %v4501_v42 }
 0x377   : > { %v1610_v43 = vpop.f32.mrb[39].mxu1  ;;  %v4528_v5 = vadd.f32 %v4492_v31, %v1605_v23  ;;  %v1609_v52 = vadd.f32 %v1608_v53, %v4457_v27  ;;  %v1846_v24 = vmul.f32 %v1814_v49, %v4504_v2  ;;  %v1900_v29 = vadd.f32 %v1868_v16, %v4474_v10 }
 0x378   : > { %v1611_v38 = vadd.f32 %v1610_v43, %v4457_v27  ;;  %v4542_v34 = vadd.f32 %v4492_v31, %v1607_v58  ;;  %v1901_v30 = vadd.f32 %v1869_v33, %v4477_v50  ;;  %v1851_v56 = vmul.f32 %v1819_v28, %v4507_v35 }
 0x379   : > { %v4538_v11 = vadd.f32 %v4510_v1, %v1609_v52  ;;  %v1821_v14 = vmul.f32 0.044715, %v4528_v5  ;;  %v1828_v8 = vmul.f32 0.044715, %v4546_v48  ;;  %v1908_v12 = vadd.f32 %v1876_v19, %v4480_v3 }
 0x37a   : > { %v4552_v60 = vadd.f32 %v4510_v1, %v1611_v38  ;;  %v1852_v55 = vmul.f32 %v1820_v20, %v4515_v36  ;;  %v1822_v23 = vmul.f32 0.044715, %v4542_v34  ;;  %v1859_v4 = vmul.f32 %v1827_v22, %v4523_v25 }
 0x37b   : > { %v1829_v13 = vmul.f32 0.044715, %v4538_v11  ;;  %v1932_v15 = vmul.f32 0.7978846, %v1900_v29  ;;  %v1853_v21 = vmul.f32 %v1821_v14, %v4528_v5  ;;  %v1940_v10 = vmul.f32 0.7978846, %v1908_v12 }
 0x37c   : > { %v1830_v53 = vmul.f32 0.044715, %v4552_v60  ;;  %v1870_v47 = vmul.f32 %v1838_v61, %v4495_v44  ;;  %v1878_v43 = vmul.f32 %v1846_v24, %v4504_v2  ;;  %v1931_v51 = vmul.f32 0.7978846, %v1899_v41 }
 0x37d   : > { %v1861_v58 = vmul.f32 %v1829_v13, %v4538_v11  ;;  %3660 = vtanh.f32 %v1932_v15  ;;  %v1877_v52 = vmul.f32 %v1845_v54, %v4501_v42  ;;  %v1883_v0 = vmul.f32 %v1851_v56, %v4507_v35 }
 0x37e   : > { %v1860_v49 = vmul.f32 %v1828_v8, %v4546_v48  ;;  %3662 = vtanh.f32 %v1940_v10  ;;  %v1854_v28 = vmul.f32 %v1822_v23, %v4542_v34  ;;  %v1891_v7 = vmul.f32 %v1859_v4, %v4523_v25 }
 0x37f   : > { %v1902_v33 = vadd.f32 %v1870_v47, %v4495_v44  ;;  %v1939_v20 = vmul.f32 0.7978846, %v1907_v45  ;;  %v1885_v38 = vmul.f32 %v1853_v21, %v4528_v5  ;;  %v1862_v22 = vmul.f32 %v1830_v53, %v4552_v60 }
 0x380   : > { %v1910_v41 = vadd.f32 %v1878_v43, %v4504_v2  ;;  %v4581_v16 = vmul.f32 0.5, %v4468_v59  ;;  %v1893_v61 = vmul.f32 %v1861_v58, %v4538_v11  ;;  %3664 = vtanh.f32 %v1931_v51 }
 0x381   : > { %v1933_v14 = vmul.f32 0.7978846, %v1901_v30  ;;  %v1884_v19 = vmul.f32 %v1852_v55, %v4515_v36  ;;  %v1909_v54 = vadd.f32 %v1877_v52, %v4501_v42  ;;  %v1915_v24 = vadd.f32 %v1883_v0, %v4507_v35 }
 0x382   : > { %v1780_v45 = vmul.f32 0.5, %v4480_v3  ;;  %v1892_v13 = vmul.f32 %v1860_v49, %v4546_v48  ;;  %v1923_v29 = vadd.f32 %v1891_v7, %v4523_v25  ;;  %v1934_v56 = vmul.f32 0.7978846, %v1902_v33 }
 0x383   : > { %3666 = vtanh.f32 %v1939_v20  ;;  %v1886_v59 = vmul.f32 %v1854_v28, %v4542_v34  ;;  %v1917_v8 = vadd.f32 %v1885_v38, %v4528_v5  ;;  %v4593_v30 = vmul.f32 0.5, %v4495_v44 }
 0x384   : > { %v1942_v12 = vmul.f32 0.7978846, %v1910_v41  ;;  %v1894_v55 = vmul.f32 %v1862_v22, %v4552_v60  ;;  %v1925_v23 = vadd.f32 %v1893_v61, %v4538_v11  ;;  %v4598_v3 = vmul.f32 0.5, %v4504_v2 }
 0x385   : > { %3668 = vtanh.f32 %v1933_v14  ;;  %v1916_v4 = vadd.f32 %v1884_v19, %v4515_v36  ;;  %v4602_v15 = vmul.f32 0.5, %v4477_v50  ;;  %v4605_v21 = vmul.f32 0.5, %v4501_v42 }
 0x386   : > { %v1941_v53 = vmul.f32 0.7978846, %v1909_v54  ;;  %v1924_v44 = vadd.f32 %v1892_v13, %v4546_v48  ;;  %3670 = vtanh.f32 %v1934_v56  ;;  %v4609_v47 = vmul.f32 0.5, %v4515_v36 }
 0x387   : > { %v3661_v10 = vpop.eup %3660  ;;  %v4612_v2 = vmul.f32 0.5, %v4546_v48  ;;  %v1918_v58 = vadd.f32 %v1886_v59, %v4542_v34  ;;  %3672 = vtanh.f32 %v1942_v12  ;;  %v4616_v50 = vmul.f32 0.5, %v4542_v34 }
 0x388   : > { %v3663_v43 = vpop.eup %3662  ;;  %v1996_v51 = vadd.f32 1.0, %v3661_v10  ;;  %v1926_v42 = vadd.f32 %v1894_v55, %v4552_v60  ;;  %v1948_v0 = vmul.f32 0.7978846, %v1916_v4  ;;  %v4620_v49 = vmul.f32 0.5, %v4552_v60 }
 0x389   : > { %v2004_v52 = vadd.f32 1.0, %v3663_v43  ;;  %v1947_v36 = vmul.f32 0.7978846, %v1915_v24  ;;  %3674 = vtanh.f32 %v1941_v53  ;;  %v1956_v48 = vmul.f32 0.7978846, %v1924_v44 }
 0x38a   : > { %v4623_v7 = vmul.f32 0.5, %v4507_v35  ;;  %v1955_v33 = vmul.f32 0.7978846, %v1923_v29  ;;  %v3665_v20 = vpop.eup %3664  ;;  %v2028_v22 = vmul.f32 %v1996_v51, %v4518_v39  ;;  %v1950_v61 = vmul.f32 0.7978846, %v1918_v58 }
 0x38b   : > { %v2036_v41 = vmul.f32 %v2004_v52, %v1780_v45  ;;  %v1958_v19 = vmul.f32 0.7978846, %v1926_v42  ;;  %v4628_v60 = vmul.f32 0.5, %v4523_v25  ;;  %v4631_v54 = vmul.f32 0.5, %v4528_v5 }
 0x38c   : > { %v4634_v35 = vmul.f32 0.5, %v4538_v11  ;;  %3676 = vtanh.f32 %v1948_v0  ;;  %v1995_v59 = vadd.f32 1.0, %v3665_v20  ;;  %v4640_v25 = vmul.f32 0.7978846, %v1917_v8 }
 0x38d   : > { %v3667_v24 = vpop.eup %3666  ;;  %v2060_v45 = vpack.c.bf16 %v2036_v41, %v2028_v22  ;;  %3678 = vtanh.f32 %v1956_v48  ;;  %v4642_v12 = vmul.f32 0.7978846, %v1925_v23 }
 0x38e   : > { %v1647_v28 = vpop.f32.mrb[36].mxu0  ;;  %3680 = vtanh.f32 %v1950_v61  ;;  %v2003_v8 = vadd.f32 1.0, %v3667_v24 }
 0x38f   : > { %v1648_v38 = vadd.f32 %v1647_v28, %v4451_v46  ;;  %v1649_v34 = vpop.f32.mrb[37].mxu0  ;;  %v3669_v5 = vpop.eup %3668  ;;  %2080 = vmatprep.subr.bf16.mxu0 %v2060_v45  ;;  %3682 = vtanh.f32 %v1958_v19 }
 0x390   : > { %v1651_v14 = vpop.f32.mrb[38].mxu0  ;;  %v1650_v55 = vadd.f32 %v1649_v34, %v4451_v46  ;;  %v3671_v23 = vpop.eup %3670  ;;  %3684 = vtanh.f32 %v1947_v36  ;;  %v4661_v34 = vadd.f32 1.0, %v3669_v5 }
 0x391   : > { %v4637_v13 = vadd.f32 %v4460_v9, %v1648_v38  ;;  %v1652_v29 = vadd.f32 %v1651_v14, %v4453_v18  ;;  %v1653_v39 = vpop.f32.mrb[39].mxu0  ;;  %v3673_v0 = vpop.eup %3672  ;;  %v4659_v38 = vmul.f32 %v1995_v59, %v4498_v32  ;;  %3686 = vtanh.f32 %v1955_v33 }
 0x392   : > { %v1700_v56 = vpop.f32.mrb[40].mxu1  ;;  %v1654_v58 = vadd.f32 %v1653_v39, %v4453_v18  ;;  %v4665_v41 = vadd.f32 %v4460_v9, %v1650_v55  ;;  %v1998_v24 = vadd.f32 1.0, %v3671_v23  ;;  %v2035_v33 = vmul.f32 %v2003_v8, %v4581_v16 }
 0x393   : > { %v1701_v11 = vadd.f32 %v1700_v56, %v4451_v46  ;;  %v1702_v4 = vpop.f32.mrb[41].mxu1  ;;  %v4647_v53 = vadd.f32 %v4464_v37, %v1652_v29  ;;  %v1807_v44 = vmul.f32 0.044715, %v4637_v13  ;;  %v4670_v61 = vpop.eup %3674  ;;  %v2006_v56 = vadd.f32 1.0, %v3673_v0 }
 0x394   : > { %v1704_v10 = vpop.f32.mrb[42].mxu1  ;;  %v1703_v51 = vadd.f32 %v1702_v4, %v4451_v46  ;;  %v4674_v14 = vadd.f32 %v4464_v37, %v1654_v58  ;;  %3688 = vtanh.f32 %v4640_v25 }
 0x395   : > { %v4652_v43 = vadd.f32 %v4460_v9, %v1701_v11  ;;  %v1705_v42 = vadd.f32 %v1704_v10, %v4453_v18  ;;  %v1706_v52 = vpop.f32.mrb[43].mxu1  ;;  %v1815_v28 = vmul.f32 0.044715, %v4647_v53  ;;  %v1808_v10 = vmul.f32 0.044715, %v4665_v41 }
 0x396   : > { %v1707_v48 = vadd.f32 %v1706_v52, %v4453_v18  ;;  %v1657_v20 = vpop.f32.mrb[40].mxu0  ;;  %v1839_v18 = vmul.f32 %v1807_v44, %v4637_v13  ;;  %v4678_v29 = vadd.f32 %v4460_v9, %v1703_v51  ;;  %v3677_v44 = vpop.eup %3676  ;;  %v1816_v51 = vmul.f32 0.044715, %v4674_v14 }
 0x397   : > { %v1809_v22 = vmul.f32 0.044715, %v4652_v43  ;;  %v4668_v46 = vadd.f32 %v4464_v37, %v1705_v42  ;;  %v1659_v36 = vpop.f32.mrb[41].mxu0  ;;  %v1658_v32 = vadd.f32 %v1657_v20, %v4455_v40  ;;  %v1847_v59 = vmul.f32 %v1815_v28, %v4647_v53  ;;  %v3679_v23 = vpop.eup %3678 }
 0x398   : > { %v1661_v19 = vpop.f32.mrb[42].mxu0  ;;  %v4684_v5 = vadd.f32 %v4464_v37, %v1707_v48  ;;  %v1660_v4 = vadd.f32 %v1659_v36, %v4455_v40  ;;  %v1871_v37 = vmul.f32 %v1839_v18, %v4637_v13  ;;  %v3681_v28 = vpop.eup %3680  ;;  %3690 = vtanh.f32 %v4642_v12 }
 0x399   : > { %v1817_v39 = vmul.f32 0.044715, %v4668_v46  ;;  %v1663_v45 = vpop.f32.mrb[43].mxu0  ;;  %v4687_v11 = vadd.f32 %v4492_v31, %v1658_v32  ;;  %v1841_v9 = vmul.f32 %v1809_v22, %v4652_v43  ;;  %v1662_v22 = vadd.f32 %v1661_v19, %v4457_v27  ;;  %v3683_v18 = vpop.eup %3682 }
 0x39a   : > { %v1710_v55 = vpop.f32.mrb[44].mxu1  ;;  %v4702_v20 = vadd.f32 %v4492_v31, %v1660_v4  ;;  %v2038_v32 = vmul.f32 %v2006_v56, %v4598_v3  ;;  %v3685_v6 = vpop.eup %3684  ;;  %v2030_v19 = vmul.f32 %v1998_v24, %v4593_v30  ;;  %v4717_v3 = vadd.f32 %v1871_v37, %v4637_v13 }
 0x39b   : > { %v1849_v58 = vmul.f32 %v1817_v39, %v4668_v46  ;;  %v1711_v16 = vadd.f32 %v1710_v55, %v4455_v40  ;;  %v1712_v8 = vpop.f32.mrb[45].mxu1  ;;  %v1823_v42 = vmul.f32 0.044715, %v4687_v11  ;;  %v1810_v39 = vmul.f32 0.044715, %v4678_v29 }
 0x39c   : > { %v1713_v52 = vadd.f32 %v1712_v8, %v4455_v40  ;;  %v1714_v0 = vpop.f32.mrb[46].mxu1  ;;  %v1879_v55 = vmul.f32 %v1847_v59, %v4647_v53  ;;  %v1818_v40 = vmul.f32 0.044715, %v4684_v5  ;;  %v1840_v56 = vmul.f32 %v1808_v10, %v4665_v41 }
 0x39d   : > { %v4699_v48 = vadd.f32 %v4492_v31, %v1711_v16  ;;  %v1716_v36 = vpop.f32.mrb[47].mxu1  ;;  %v1715_v8 = vadd.f32 %v1714_v0, %v4457_v27  ;;  %v1873_v16 = vmul.f32 %v1841_v9, %v4652_v43  ;;  %v1881_v4 = vmul.f32 %v1849_v58, %v4668_v46  ;;  %v3687_v0 = vpop.eup %3686 }
 0x39e   : > { %v4713_v26 = vadd.f32 %v4492_v31, %v1713_v52  ;;  %v1848_v59 = vmul.f32 %v1816_v51, %v4674_v14  ;;  %v1855_v17 = vmul.f32 %v1823_v42, %v4687_v11  ;;  %v1824_v9 = vmul.f32 0.044715, %v4702_v20 }
 0x39f   : > { %v1825_v57 = vmul.f32 0.044715, %v4699_v48  ;;  %v4725_v58 = vadd.f32 %v4510_v1, %v1662_v22  ;;  %v1664_v31 = vadd.f32 %v1663_v45, %v4457_v27  ;;  %v1842_v30 = vmul.f32 %v1810_v39, %v4678_v29 }
 0x3a0   : > { %v1911_v24 = vadd.f32 %v1879_v55, %v4647_v53  ;;  %v1850_v10 = vmul.f32 %v1818_v40, %v4684_v5  ;;  %v2062_v37 = vpack.c.bf16 %v2038_v32, %v2030_v19  ;;  %v4732_v51 = vadd.f32 %v1873_v16, %v4652_v43 }
 0x3a1   : > { %v4735_v42 = vadd.f32 %v1881_v4, %v4668_v46  ;;  %v1826_v52 = vmul.f32 0.044715, %v4713_v26  ;;  %v4739_v22 = vadd.f32 %v4510_v1, %v1715_v8  ;;  %v1887_v45 = vmul.f32 %v1855_v17, %v4687_v11 }
 0x3a2   : > { %v1717_v39 = vadd.f32 %v1716_v36, %v4457_v27  ;;  %2121 = vmatprep.subr.bf16.mxu1 %v2062_v37  ;;  %v2059_v55 = vpack.c.bf16 %v2035_v33, %v4659_v38  ;;  %v2005_v32 = vadd.f32 1.0, %v4670_v61  ;;  %v1857_v40 = vmul.f32 %v1825_v57, %v4699_v48 }
 0x3a3   : > { %v4747_v16 = vmul.f32 %v1824_v9, %v4702_v20  ;;  %v1831_v4 = vmul.f32 0.044715, %v4725_v58  ;;  %v4751_v19 = vadd.f32 %v4510_v1, %v1664_v31  ;;  %v2029_v17 = vmul.f32 %v4661_v34, %v4602_v15 }
 0x3a4   : > { %2081 = vmatpush1.bf16.msra.mxu0 %v2059_v55  ;;  %v2037_v27 = vmul.f32 %v2005_v32, %v4605_v21  ;;  %v2012_v36 = vadd.f32 1.0, %v3677_v44  ;;  %v2020_v38 = vadd.f32 1.0, %v3679_v23  ;;  %v1858_v61 = vmul.f32 %v1826_v52, %v4713_v26 }
 0x3a5   : > { %v1833_v57 = vmul.f32 0.044715, %v4739_v22  ;;  %v2014_v33 = vadd.f32 1.0, %v3681_v28  ;;  %v2022_v8 = vadd.f32 1.0, %v3683_v18  ;;  %v4759_v9 = vadd.f32 %v4510_v1, %v1717_v39 }
 0x3a6   : > { %v2061_v37 = vpack.c.bf16 %v2037_v27, %v2029_v17  ;;  %v2044_v31 = vmul.f32 %v2012_v36, %v4609_v47  ;;  %v2052_v55 = vmul.f32 %v2020_v38, %v4612_v2  ;;  %v2011_v34 = vadd.f32 1.0, %v3685_v6 }
 0x3a7   : > { %v2046_v15 = vmul.f32 %v2014_v33, %v4616_v50  ;;  %v2054_v21 = vmul.f32 %v2022_v8, %v4620_v49  ;;  %v2019_v44 = vadd.f32 1.0, %v3687_v0  ;;  %v1863_v23 = vmul.f32 %v1831_v4, %v4725_v58 }
 0x3a8   : > { %v1832_v52 = vmul.f32 0.044715, %v4751_v19  ;;  %2122 = vmatpush1.bf16.msra.mxu1 %v2061_v37  ;;  %v2068_v28 = vpack.c.bf16 %v2052_v55, %v2044_v31  ;;  %v2043_v18 = vmul.f32 %v2011_v34, %v4623_v7  ;;  %v1889_v2 = vmul.f32 %v1857_v40, %v4699_v48 }
 0x3a9   : > { %v2070_v1 = vpack.c.bf16 %v2054_v21, %v2046_v15  ;;  %v2051_v47 = vmul.f32 %v2019_v44, %v4628_v60  ;;  %v1834_v6 = vmul.f32 0.044715, %v4759_v9  ;;  %v1872_v50 = vmul.f32 %v1840_v56, %v4665_v41  ;;  %v3689_v15 = vpop.eup %3688 }
 0x3aa   : > { %2082 = vmatprep.subr.bf16.mxu0 %v2068_v28  ;;  %v1880_v49 = vmul.f32 %v1848_v59, %v4674_v14  ;;  %v1865_v0 = vmul.f32 %v1833_v57, %v4739_v22  ;;  %v1874_v39 = vmul.f32 %v1842_v30, %v4678_v29  ;;  %v1882_v7 = vmul.f32 %v1850_v10, %v4684_v5  ;;  %v4786_v59 = vld [vmem:[%s5389_s5 + $0x2] sm:$0x3] }
 0x3ab   : > { %2123 = vmatprep.subr.bf16.mxu1 %v2070_v1  ;;  %v2067_v25 = vpack.c.bf16 %v2051_v47, %v2043_v18  ;;  %v1895_v60 = vmul.f32 %v1863_v23, %v4725_v58  ;;  %v1904_v12 = vadd.f32 %v1872_v50, %v4665_v41  ;;  %v1935_v40 = vmul.f32 0.7978846, %v4717_v3  ;;  %v3691_v23 = vpop.eup %3690 }
 0x3ac   : > { %v1912_v32 = vadd.f32 %v1880_v49, %v4674_v14  ;;  %v1864_v56 = vmul.f32 %v1832_v52, %v4751_v19  ;;  %v1906_v30 = vadd.f32 %v1874_v39, %v4678_v29  ;;  %v1914_v10 = vadd.f32 %v1882_v7, %v4684_v5 }
 0x3ad   : > { %2083 = vmatpush1.bf16.msra.mxu0 %v2067_v25  ;;  %v1943_v4 = vmul.f32 0.7978846, %v1911_v24  ;;  %v1866_v17 = vmul.f32 %v1834_v6, %v4759_v9  ;;  %v1936_v27 = vmul.f32 0.7978846, %v1904_v12  ;;  %3692 = vtanh.f32 %v1935_v40 }
 0x3ae   : > { %v1944_v36 = vmul.f32 0.7978846, %v1912_v32  ;;  %v1919_v3 = vadd.f32 %v1887_v45, %v4687_v11  ;;  %v1938_v38 = vmul.f32 0.7978846, %v1906_v30  ;;  %v1946_v57 = vmul.f32 0.7978846, %v1914_v10 }
 0x3af   : > { %3694 = vtanh.f32 %v1943_v4  ;;  %v1921_v33 = vadd.f32 %v1889_v2, %v4699_v48  ;;  %v1897_v8 = vmul.f32 %v1865_v0, %v4739_v22  ;;  %v1937_v24 = vmul.f32 0.7978846, %v4732_v51 }
 0x3b0   : > { %3424 = vmatmul.mubr.msk.bf16.vlgmr.msra.gmra.mrb[44].mxu0 %vm1110_vm3, %v4786_v59  ;;  %3696 = vtanh.f32 %v1936_v27  ;;  %v1945_v37 = vmul.f32 0.7978846, %v4735_v42  ;;  %v1888_v31 = vmul.f32 %v4747_v16, %v4702_v20  ;;  %v1896_v45 = vmul.f32 %v1864_v56, %v4751_v19 }
 0x3b1   : > { %3698 = vtanh.f32 %v1944_v36  ;;  %v5423_v55 = vmov 0   ;;  %v1927_v21 = vadd.f32 %v1895_v60, %v4725_v58  ;;  %v1890_v34 = vmul.f32 %v1858_v61, %v4713_v26 }
 0x3b2   : > { %2194 = vmatprep.mubr.bf16.mxu0 %v5423_v55  ;;  %3700 = vtanh.f32 %v1938_v38  ;;  %v1898_v44 = vmul.f32 %v1866_v17, %v4759_v9  ;;  %v2013_v51 = vadd.f32 1.0, %v3689_v15  ;;  %v1920_v42 = vadd.f32 %v1888_v31, %v4702_v20 }
 0x3b3   : > { %3702 = vtanh.f32 %v1946_v57  ;;  %v1928_v52 = vadd.f32 %v1896_v45, %v4751_v19  ;;  %v2021_v16 = vadd.f32 1.0, %v3691_v23  ;;  %v1922_v28 = vadd.f32 %v1890_v34, %v4713_v26 }
 0x3b4   : > { %3704 = vtanh.f32 %v1937_v24  ;;  %v1930_v1 = vadd.f32 %v1898_v44, %v4759_v9  ;;  %v1929_v18 = vadd.f32 %v1897_v8, %v4739_v22  ;;  %v1952_v47 = vmul.f32 0.7978846, %v1920_v42 }
 0x3b5   : > { %3706 = vtanh.f32 %v1945_v37  ;;  %v1960_v61 = vmul.f32 0.7978846, %v1928_v52  ;;  %v2045_v2 = vmul.f32 %v2013_v51, %v4631_v54  ;;  %v2053_v6 = vmul.f32 %v2021_v16, %v4634_v35 }
 0x3b6   : > { %v1954_v50 = vmul.f32 0.7978846, %v1922_v28  ;;  %v1962_v49 = vmul.f32 0.7978846, %v1930_v1  ;;  %3708 = vtanh.f32 %v1952_v47  ;;  %v1951_v0 = vmul.f32 0.7978846, %v1919_v3 }
 0x3b7   : > { %v3693_v25 = vpop.eup %3692  ;;  %v2069_v39 = vpack.c.bf16 %v2053_v6, %v2045_v2  ;;  %v1776_v7 = vmul.f32 0.5, %v4665_v41  ;;  %3710 = vtanh.f32 %v1960_v61  ;;  %v1959_v60 = vmul.f32 0.7978846, %v1927_v21 }
 0x3b8   : > { %v1775_v32 = vmul.f32 0.5, %v4637_v13  ;;  %v1999_v40 = vadd.f32 1.0, %v3693_v25  ;;  %3712 = vtanh.f32 %v1954_v50  ;;  %v1953_v56 = vmul.f32 0.7978846, %v1921_v33 }
 0x3b9   : > { %v3695_v12 = vpop.eup %3694  ;;  %2124 = vmatpush1.bf16.msra.mxu1 %v2069_v39  ;;  %v1783_v54 = vmul.f32 0.5, %v4647_v53  ;;  %3714 = vtanh.f32 %v1962_v49  ;;  %v1961_v10 = vmul.f32 0.7978846, %v1929_v18  ;;  %v1784_v17 = vmul.f32 0.5, %v4674_v14 }
 0x3ba   : > { %v3697_v30 = vpop.eup %3696  ;;  %v2007_v35 = vadd.f32 1.0, %v3695_v12  ;;  %v1778_v41 = vmul.f32 0.5, %v4678_v29  ;;  %3716 = vtanh.f32 %v1951_v0  ;;  %v2031_v13 = vmul.f32 %v1999_v40, %v1775_v32 }
 0x3bb   : > { %v3699_v4 = vpop.eup %3698  ;;  %v2000_v27 = vadd.f32 1.0, %v3697_v30  ;;  %3718 = vtanh.f32 %v1959_v60  ;;  %v1786_v33 = vmul.f32 0.5, %v4684_v5  ;;  %v1777_v45 = vmul.f32 0.5, %v4652_v43 }
 0x3bc   : > { %v3701_v36 = vpop.eup %3700  ;;  %v2008_v3 = vadd.f32 1.0, %v3699_v4  ;;  %v2039_v38 = vmul.f32 %v2007_v35, %v1783_v54  ;;  %3425 = vmatmul.mubr.msk.bf16.vlgmr.msra.gmra.mrb[48].mxu1 %vm1110_vm3, %v4786_v59  ;;  %3720 = vtanh.f32 %v1953_v56  ;;  %v1785_v15 = vmul.f32 0.5, %v4668_v46 }
 0x3bd   : > { %v3703_v57 = vpop.eup %3702  ;;  %v2032_v53 = vmul.f32 %v2000_v27, %v1776_v7  ;;  %v2002_v8 = vadd.f32 1.0, %v3701_v36  ;;  %3722 = vtanh.f32 %v1961_v10  ;;  %2235 = vmatprep.mubr.bf16.mxu1 %v5423_v55  ;;  %v1792_v47 = vmul.f32 0.5, %v4702_v20 }
 0x3be   : > { %v3705_v24 = vpop.eup %3704  ;;  %v2040_v14 = vmul.f32 %v2008_v3, %v1784_v17  ;;  %v2010_v37 = vadd.f32 1.0, %v3703_v57  ;;  %v2063_v31 = vpack.c.bf16 %v2039_v38, %v2031_v13  ;;  %v1800_v43 = vmul.f32 0.5, %v4751_v19  ;;  %v3791_v13 = vld [vmem:[%s4031_s12] sm:$0xff]  ;;  %v3431_v38 = vld [vmem:[%s5388_s4 + $0x50] sm:$0xff]  ;;  %v3432_v57 = vld [vmem:[%s5388_s4 + $0x58] sm:$0xff]  ;;  %s309_s12 = scalar_lea.vmem [#allocation2], %s3366_s10 }
 0x3bf   : > { %v3707_v29 = vpop.eup %3706  ;;  %v2001_v21 = vadd.f32 1.0, %v3705_v24  ;;  %v2034_v44 = vmul.f32 %v2002_v8, %v1778_v41  ;;  %v1794_v6 = vmul.f32 0.5, %v4713_v26  ;;  %v1802_v39 = vmul.f32 0.5, %v4759_v9  ;;  %s3270_s11 = sshll.u32 %s309_s12, 4  ;;  %s5331_s11 = int_to_ptr.vmem [resolvable:$true] %s3270_s11 }
 0x3c0   : > { %v2064_v34 = vpack.c.bf16 %v2040_v14, %v2032_v53  ;;  %v2042_v23 = vmul.f32 %v2010_v37, %v1786_v33  ;;  %v2009_v51 = vadd.f32 1.0, %v3707_v29  ;;  %v3709_v5 = vpop.eup %3708  ;;  %v1791_v12 = vmul.f32 0.5, %v4687_v11  ;;  %v2269_v53 = vpop.permute.xlu1 %2268  ;;  %s3792_s18 = scalar_lea.vmem %s5331_s11, 512  ;;  %p3799_p4 = scmp.lt.s32.totalorder %s5331_s11, %s3797_s23 }
 0x3c1   : > { %v3711_v42 = vpop.eup %3710  ;;  %v2033_v16 = vmul.f32 %v2001_v21, %v1777_v45  ;;  %v2016_v1 = vadd.f32 1.0, %v3709_v5  ;;  %v1799_v20 = vmul.f32 0.5, %v4725_v58  ;;  %v1793_v35 = vmul.f32 0.5, %v4699_v48  ;;  %v3429_v48 = vld [vmem:[%s5388_s4 + $0x40] sm:$0xff]  ;;  %p3793_p0 = scmp.ne.s32.totalorder %s5331_s11, %s3792_s18  ;;  %p3800_p5 = scmp.lt.s32.totalorder %s3798_s16, %s3792_s18 }
 0x3c2   : > { %2162 = vmatprep.subr.bf16.mxu0 %v2064_v34  ;;  %v2066_v52 = vpack.c.bf16 %v2042_v23, %v2034_v44  ;;  %v2041_v28 = vmul.f32 %v2009_v51, %v1785_v15  ;;  %v3713_v18 = vpop.eup %3712  ;;  %v2024_v61 = vadd.f32 1.0, %v3711_v42  ;;  %v1801_v10 = vmul.f32 0.5, %v4739_v22  ;;  %v3430_v22 = vld [vmem:[%s5388_s4 + $0x48] sm:$0xff]  ;;  %v3594_v44 = vld [vmem:[%s5386_s2 + $0x20] sm:$0xff]  }
 0x3c3   : > { %2163 = vmatpush1.bf16.msra.mxu0 %v2063_v31  ;;  %v3715_v46 = vpop.eup %3714  ;;  %v2018_v50 = vadd.f32 1.0, %v3713_v18  ;;  %v2048_v0 = vmul.f32 %v2016_v1, %v1792_v47  ;;  %v2276_v37 = vrot.slane %v2269_v53, %v4377_v62  ;;  %v3595_v1 = vld [vmem:[%s5386_s2 + $0x28] sm:$0xff]   ;;  %p3794_p1 = pnand %p3793_p0, %p3983_p3  ;;  %p3801_p6 = por %p3800_p5, %p3799_p4 }
 0x3c4   : > { %2203 = vmatprep.subr.bf16.mxu1 %v2066_v52  ;;  %v2065_v2 = vpack.c.bf16 %v2041_v28, %v2033_v16  ;;  %v3717_v49 = vpop.eup %3716  ;;  %v2056_v25 = vmul.f32 %v2024_v61, %v1800_v43  ;;  %v2026_v7 = vadd.f32 1.0, %v3715_v46  ;;  %v5425_v52 = vld [vmem:[#allocation10_spill] sm:$0xff] }
 0x3c5   : > { %v3719_v60 = vpop.eup %3718  ;;  %v2015_v19 = vadd.f32 1.0, %v3717_v49  ;;  %v2050_v56 = vmul.f32 %v2018_v50, %v1794_v6  ;;  %p3795_p2 = pneg %p3794_p1 }
 0x3c6   : > { %2204 = vmatpush1.bf16.msra.mxu1 %v2065_v2  ;;  %v3721_v32 = vpop.eup %3720  ;;  %v2072_v40 = vpack.c.bf16 %v2056_v25, %v2048_v0  ;;  %v2058_v30 = vmul.f32 %v2026_v7, %v1802_v39  ;;  %v2023_v54 = vadd.f32 1.0, %v3719_v60  ;;  %v5427_v39 = vld [vmem:[#allocation11_spill] sm:$0xff] }
 0x3c7   : > { %v3723_v26 = vpop.eup %3722  ;;  %v2017_v9 = vadd.f32 1.0, %v3721_v32  ;;  %v2047_v17 = vmul.f32 %v2015_v19, %v1791_v12  ;;  %v5429_v32 = vld [vmem:[#allocation12_spill] sm:$0xff]  ;;  %p3802_p7 = pnand %p3801_p6, %p3795_p2 }
 0x3c8   : > { %2164 = vmatprep.subr.bf16.mxu0 %v2072_v40  ;;  %v2074_v4 = vpack.c.bf16 %v2058_v30, %v2050_v56  ;;  %v2055_v27 = vmul.f32 %v2023_v54, %v1799_v20  ;;  %v2025_v11 = vadd.f32 1.0, %v3723_v26 }
 0x3c9   : > { %v2049_v41 = vmul.f32 %v2017_v9, %v1793_v35 }
 0x3ca   : > { %2205 = vmatprep.subr.bf16.mxu1 %v2074_v4  ;;  %v2071_v58 = vpack.c.bf16 %v2055_v27, %v2047_v17  ;;  %v2057_v36 = vmul.f32 %v2025_v11, %v1801_v10 }
 0x3cc   : > { %2165 = vmatpush1.bf16.msra.mxu0 %v2071_v58  ;;  %v2073_v3 = vpack.c.bf16 %v2057_v36, %v2049_v41  ;;  %v3464_v36 = vld [vmem:[%s5390_s6 + $0x8] sm:$0xf] }
 0x3cd   : > { %3502 = vmatprep.subr.mxu0 %v3791_v13 }
 0x3ce   : > { %2206 = vmatpush1.bf16.msra.mxu1 %v2073_v3  ;;  %v4916_v3 = vpop.permute.xlu0 %2416 }
 0x3cf   : > { %3426 = vmatmul.mubr.msk.bf16.vlgmr.msra.gmra.mrb[48].mxu0 %vm1110_vm3, %v4786_v59 }
 0x3d0   : > { %3503 = vmatpush3.msra.mxu0 %v3791_v13  ;;  %3504 = vmatprep.mubr.msk.f32.mxu0 %vm337_vm0, %v3429_v48  ;;  %v4918_v13 = vpop.permute.xlu1 %2421 }
 0x3d1   : > { %3427 = vmatmul.mubr.msk.bf16.vlgmr.msra.gmra.mrb[52].mxu1 %vm1110_vm3, %v4786_v59 }
 0x3d2   : > { %2506 = vmatprep.mubr.bf16.mxu1 %v5423_v55  ;;  %v4920_v48 = vpop.permute.xlu0 %2426 }
 0x3d7   : > { %3505 = vmatmul.mubr.msk.f32.vlgmr.msra.gmra.mrb[2].mxu0 %vm337_vm0, %v3430_v22  ;;  %v4922_v22 = vpop.permute.xlu1 %2431 }
 0x3d8   : > { %3507 = vmatprep.mubr.msk.f32.mxu0 %vm337_vm0, %v3431_v38 }
 0x3db   : > { %3508 = vmatmul.mubr.msk.f32.gmra.mrb[52].mxu0 %vm337_vm0, %v3432_v57 }
 0x3dc   : > { %2559 = vmatprep.mubr.bf16.mxu0 %v5423_v55 }
 0x483   : > { %v2114_v59 = vpop.f32.mrb[44].mxu0 }
 0x484   : > { %v2116_v33 = vpop.f32.mrb[45].mxu0 }
 0x485   : > { %v2252_v8 = vcombine.low %v2114_v59, %v2116_v33  ;;  %v2118_v24 = vpop.f32.mrb[46].mxu0 }
 0x486   : > { %v2119_v14 = vpop.f32.mrb[47].mxu0 }
 0x487   : > { %v2260_v31 = vadd.f32 %v2252_v8, %v4381_v63 }
 0x489   : > { %v4856_v29 = vadd.f32 %v2276_v37, %v2260_v31 }
 0x48b   : > { %5424 = vst [vmem:[#allocation13_spill] sm:$0xff] %v4856_v29  ;;  %v2393_v45 = vcombine.high %v4856_v29, %v4856_v29  ;;  %v2401_v15 = vpack.c.bf16 %v4856_v29, %v4856_v29 }
 0x48d   : > { %v2402_v21 = vpack.c.bf16 %v2393_v45, %v2393_v45  ;;  %v2451_v34 = vsel %vm516_vm1, %v2401_v15, 0 }
 0x48f   : > { %3447 = vmatprep.subr.msk.bf16.mxu1 %vm516_vm1, %v2402_v21  ;;  %v2155_v23 = vpop.f32.mrb[48].mxu1 }
 0x490   : > { %2475 = vmatpush1.bf16.msra.mxu1 %v2451_v34  ;;  %v2157_v63 = vpop.f32.mrb[49].mxu1 }
 0x491   : > { %v2253_v51 = vcombine.low %v2155_v23, %v2157_v63  ;;  %v2159_v5 = vpop.f32.mrb[50].mxu1 }
 0x492   : > { %v2160_v42 = vpop.f32.mrb[51].mxu1 }
 0x493   : > { %3448 = vmatmul.mubr.msk.bf16.vlgmr.msra.gmra.mrb[56].mxu1 %vm509_vm2, %v3594_v44  ;;  %v2261_v16 = vadd.f32 %v2253_v51, %v5425_v52 }
 0x494   : > { %2516 = vmatprep.mubr.bf16.mxu1 %v5423_v55 }
 0x495   : > { %v4870_v28 = vadd.f32 %v2276_v37, %v2261_v16 }
 0x497   : > { %5426 = vst [vmem:[#allocation10_spill] sm:$0xff] %v4870_v28  ;;  %v2394_v18 = vcombine.high %v4870_v28, %v4870_v28  ;;  %v2403_v47 = vpack.c.bf16 %v4870_v28, %v4870_v28 }
 0x499   : > { %v2404_v43 = vpack.c.bf16 %v2394_v18, %v2394_v18  ;;  %v2457_v61 = vsel %vm516_vm1, %v2403_v47, 0 }
 0x49b   : > { %3449 = vmatmul.mubr.msk.bf16.gmra.mrb[60].mxu1 %vm509_vm2, %v3595_v1  ;;  %3450 = vmatprep.subr.msk.bf16.mxu0 %vm516_vm1, %v2404_v43 }
 0x49c   : > { %2612 = vmatprep.mubr.bf16.mxu1 %v5423_v55  ;;  %2528 = vmatpush1.bf16.msra.mxu0 %v2457_v61 }
 0x49f   : > { %3451 = vmatmul.mubr.msk.bf16.vlgmr.msra.gmra.mrb[56].mxu0 %vm509_vm2, %v3594_v44 }
 0x4a0   : > { %2569 = vmatprep.mubr.bf16.mxu0 %v5423_v55 }
 0x4a2   : > { %v2196_v46 = vpop.f32.mrb[48].mxu0 }
 0x4a3   : > { %v2198_v2 = vpop.f32.mrb[49].mxu0 }
 0x4a4   : > { %v2237_v6 = vpop.f32.mrb[52].mxu1  ;;  %v2254_v50 = vcombine.low %v2196_v46, %v2198_v2  ;;  %v2200_v49 = vpop.f32.mrb[50].mxu0 }
 0x4a5   : > { %v2239_v0 = vpop.f32.mrb[53].mxu1  ;;  %v2201_v25 = vpop.f32.mrb[51].mxu0 }
 0x4a6   : > { %v2262_v7 = vadd.f32 %v2254_v50, %v5427_v39  ;;  %v2255_v60 = vcombine.low %v2237_v6, %v2239_v0  ;;  %v2241_v12 = vpop.f32.mrb[54].mxu1 }
 0x4a7   : > { %v2242_v20 = vpop.f32.mrb[55].mxu1  ;;  %3452 = vmatmul.mubr.msk.bf16.gmra.mrb[60].mxu0 %vm509_vm2, %v3595_v1 }
 0x4a8   : > { %v4887_v19 = vadd.f32 %v2276_v37, %v2262_v7  ;;  %v2263_v40 = vadd.f32 %v2255_v60, %v5429_v32  ;;  %2665 = vmatprep.mubr.bf16.mxu0 %v5423_v55 }
 0x4aa   : > { %5428 = vst [vmem:[#allocation11_spill] sm:$0xff] %v4887_v19  ;;  %v4891_v56 = vadd.f32 %v2276_v37, %v2263_v40  ;;  %v3506_v30 = vpop.f32.mrb[2].mxu0  ;;  %v2395_v54 = vcombine.high %v4887_v19, %v4887_v19  ;;  %v2405_v26 = vpack.c.bf16 %v4887_v19, %v4887_v19 }
 0x4ab   : > { %2693 = vperm.xlu1 %3587, %v3506_v30   ;;  %v2365_v35 = vpop.f32.mrb[3].mxu0 }
 0x4ac   : > { %5430 = vst [vmem:[#allocation12_spill] sm:$0xff] %v4891_v56  ;;  %2688 = vperm.xlu0 %3586, %v2365_v35   ;;  %v2406_v10 = vpack.c.bf16 %v2395_v54, %v2395_v54  ;;  %v2396_v9 = vcombine.high %v4891_v56, %v4891_v56  ;;  %v2407_v4 = vpack.c.bf16 %v4891_v56, %v4891_v56  ;;  %v2463_v11 = vsel %vm516_vm1, %v2405_v26, 0 }
 0x4ae   : > { %v3509_v17 = vpop.f32.mrb[52].mxu0  ;;  %3453 = vmatprep.subr.msk.bf16.mxu1 %vm516_vm1, %v2406_v10  ;;  %v2408_v27 = vpack.c.bf16 %v2396_v9, %v2396_v9  ;;  %v2469_v41 = vsel %vm516_vm1, %v2407_v4, 0 }
 0x4af   : > { %2581 = vmatpush1.bf16.msra.mxu1 %v2463_v11  ;;  %2703 = vperm.xlu1 %3587, %v3509_v17   ;;  %v2375_v58 = vpop.f32.mrb[53].mxu0 }
 0x4b0   : > { %3456 = vmatprep.subr.msk.bf16.mxu0 %vm516_vm1, %v2408_v27  ;;  %2698 = vperm.xlu0 %3586, %v2375_v58  }
 0x4b1   : > { %2634 = vmatpush1.bf16.msra.mxu0 %v2469_v41 }
 0x4b2   : > { %3454 = vmatmul.mubr.msk.bf16.vlgmr.msra.gmra.mrb[64].mxu1 %vm509_vm2, %v3594_v44 }
 0x4b3   : > { %2622 = vmatprep.mubr.bf16.mxu1 %v5423_v55 }
 0x4b4   : > { %3457 = vmatmul.mubr.msk.bf16.vlgmr.msra.gmra.mrb[64].mxu0 %vm509_vm2, %v3594_v44  ;;  %3235 = vperm.xlu0 %3586, %v3464_v36  }
 0x4b5   : > { %2675 = vmatprep.mubr.bf16.mxu0 %v5423_v55 }
 0x4ba   : > { %3455 = vmatmul.mubr.msk.bf16.gmra.mrb[68].mxu1 %vm509_vm2, %v3595_v1 }
 0x4bb   : > { %3079 = vmatprep.mubr.bf16.mxu1 %v5423_v55 }
 0x4bc   : > { %3458 = vmatmul.mubr.msk.bf16.gmra.mrb[68].mxu0 %vm509_vm2, %v3595_v1 }
 0x4bd   : > { %3120 = vmatprep.mubr.bf16.mxu0 %v5423_v55 }
 0x52a   : > { %v4930_v31 = vpop.permute.xlu1 %2693 }
 0x52b   : > { %v4925_v53 = vpop.permute.xlu0 %2688 }
 0x52e   : > { %v4945_v60 = vpop.permute.xlu1 %2703 }
 0x52f   : > { %v4937_v18 = vpop.permute.xlu0 %2698 }
 0x566   : > { %v2508_v38 = vpop.f32.mrb[56].mxu1 }
 0x567   : > { %v2509_v57 = vadd.f32 %v2508_v38, %v4916_v3  ;;  %v2510_v59 = vpop.f32.mrb[57].mxu1 }
 0x568   : > { %v2511_v33 = vadd.f32 %v2510_v59, %v4916_v3  ;;  %v2512_v8 = vpop.f32.mrb[58].mxu1 }
 0x569   : > { %v2706_v24 = vadd.f32 %v4925_v53, %v2509_v57  ;;  %v2513_v14 = vadd.f32 %v2512_v8, %v4918_v13  ;;  %v2514_v37 = vpop.f32.mrb[59].mxu1 }
 0x56a   : > { %v2707_v45 = vadd.f32 %v4925_v53, %v2511_v33  ;;  %v2515_v15 = vadd.f32 %v2514_v37, %v4918_v13 }
 0x56b   : > { %v2770_v21 = vmul.f32 0.044715, %v2706_v24  ;;  %v2714_v34 = vadd.f32 %v4930_v31, %v2513_v14  ;;  %v4953_v30 = vmul.f32 0.5, %v2706_v24 }
 0x56c   : > { %v2771_v44 = vmul.f32 0.044715, %v2707_v45  ;;  %v2715_v23 = vadd.f32 %v4930_v31, %v2515_v15  ;;  %v4951_v40 = vmul.f32 0.5, %v2707_v45 }
 0x56d   : > { %v2802_v63 = vmul.f32 %v2770_v21, %v2706_v24  ;;  %v2778_v51 = vmul.f32 0.044715, %v2714_v34  ;;  %v4959_v9 = vmul.f32 0.5, %v2714_v34 }
 0x56e   : > { %v2803_v5 = vmul.f32 %v2771_v44, %v2707_v45  ;;  %v2779_v42 = vmul.f32 0.044715, %v2715_v23  ;;  %v2518_v52 = vpop.f32.mrb[60].mxu1  ;;  %v4962_v58 = vmul.f32 0.5, %v2715_v23 }
 0x56f   : > { %v2519_v16 = vadd.f32 %v2518_v52, %v4920_v48  ;;  %v2520_v1 = vpop.f32.mrb[61].mxu1  ;;  %v2834_v2 = vmul.f32 %v2802_v63, %v2706_v24  ;;  %v2810_v6 = vmul.f32 %v2778_v51, %v2714_v34 }
 0x570   : > { %v2811_v47 = vmul.f32 %v2779_v42, %v2715_v23  ;;  %v2521_v43 = vadd.f32 %v2520_v1, %v4920_v48  ;;  %v2522_v61 = vpop.f32.mrb[62].mxu1  ;;  %v2835_v46 = vmul.f32 %v2803_v5, %v2707_v45 }
 0x571   : > { %v4941_v50 = vadd.f32 %v4937_v18, %v2519_v16  ;;  %v2523_v49 = vadd.f32 %v2522_v61, %v4922_v22  ;;  %v2524_v0 = vpop.f32.mrb[63].mxu1  ;;  %v2866_v4 = vadd.f32 %v2834_v2, %v2706_v24  ;;  %v2842_v27 = vmul.f32 %v2810_v6, %v2714_v34 }
 0x572   : > { %v2525_v25 = vadd.f32 %v2524_v0, %v4922_v22  ;;  %v2843_v39 = vmul.f32 %v2811_v47, %v2715_v23  ;;  %v2867_v7 = vadd.f32 %v2835_v46, %v2707_v45  ;;  %v2561_v12 = vpop.f32.mrb[56].mxu0  ;;  %v4949_v32 = vadd.f32 %v4937_v18, %v2521_v43 }
 0x573   : > { %v2786_v20 = vmul.f32 0.044715, %v4941_v50  ;;  %v2562_v54 = vadd.f32 %v2561_v12, %v4916_v3  ;;  %v2563_v26 = vpop.f32.mrb[57].mxu0  ;;  %v4957_v35 = vadd.f32 %v4945_v60, %v2523_v49  ;;  %v2898_v51 = vmul.f32 0.7978846, %v2866_v4 }
 0x574   : > { %v2875_v10 = vadd.f32 %v2843_v39, %v2715_v23  ;;  %v2564_v17 = vadd.f32 %v2563_v26, %v4916_v3  ;;  %v2565_v11 = vpop.f32.mrb[58].mxu0  ;;  %v4969_v57 = vadd.f32 %v4945_v60, %v2525_v25  ;;  %v2899_v59 = vmul.f32 0.7978846, %v2867_v7 }
 0x575   : > { %v4965_v41 = vadd.f32 %v4925_v53, %v2562_v54  ;;  %v2566_v36 = vadd.f32 %v2565_v11, %v4918_v13  ;;  %v2567_v38 = vpop.f32.mrb[59].mxu0  ;;  %v2818_v24 = vmul.f32 %v2786_v20, %v4941_v50  ;;  %v2787_v14 = vmul.f32 0.044715, %v4949_v32 }
 0x576   : > { %v2709_v33 = vadd.f32 %v4925_v53, %v2564_v17  ;;  %v2568_v8 = vadd.f32 %v2567_v38, %v4918_v13  ;;  %v2794_v15 = vmul.f32 0.044715, %v4957_v35  ;;  %v2907_v21 = vmul.f32 0.7978846, %v2875_v10 }
 0x577   : > { %v2772_v37 = vmul.f32 0.044715, %v4965_v41  ;;  %v4977_v45 = vadd.f32 %v4930_v31, %v2566_v36  ;;  %v2874_v23 = vadd.f32 %v2842_v27, %v2714_v34  ;;  %v2795_v52 = vmul.f32 0.044715, %v4969_v57 }
 0x578   : > { %v2773_v44 = vmul.f32 0.044715, %v2709_v33  ;;  %v2717_v63 = vadd.f32 %v4930_v31, %v2568_v8  ;;  %3724 = vtanh.f32 %v2899_v59  ;;  %v4985_v43 = vmul.f32 %v2787_v14, %v4949_v32 }
 0x579   : > { %v2804_v5 = vmul.f32 %v2772_v37, %v4965_v41  ;;  %v2780_v42 = vmul.f32 0.044715, %v4977_v45  ;;  %3726 = vtanh.f32 %v2907_v21  ;;  %v2850_v34 = vmul.f32 %v2818_v24, %v4941_v50 }
 0x57a   : > { %v2805_v16 = vmul.f32 %v2773_v44, %v2709_v33  ;;  %v2781_v1 = vmul.f32 0.044715, %v2717_v63  ;;  %v2571_v47 = vpop.f32.mrb[60].mxu0  ;;  %v2826_v6 = vmul.f32 %v2794_v15, %v4957_v35  ;;  %v4999_v26 = vmul.f32 %v2795_v52, %v4969_v57 }
 0x57b   : > { %v2812_v61 = vmul.f32 %v2780_v42, %v4977_v45  ;;  %v2572_v46 = vadd.f32 %v2571_v47, %v4920_v48  ;;  %v2573_v2 = vpop.f32.mrb[61].mxu0  ;;  %v2836_v49 = vmul.f32 %v2804_v5, %v4965_v41  ;;  %v2906_v8 = vmul.f32 0.7978846, %v2874_v23 }
 0x57c   : > { %v2813_v0 = vmul.f32 %v2781_v1, %v2717_v63  ;;  %v2574_v25 = vadd.f32 %v2573_v2, %v4920_v48  ;;  %v2575_v39 = vpop.f32.mrb[62].mxu0  ;;  %v2837_v7 = vmul.f32 %v2805_v16, %v2709_v33  ;;  %v2858_v38 = vmul.f32 %v2826_v6, %v4957_v35 }
 0x57d   : > { %v2844_v12 = vmul.f32 %v2812_v61, %v4977_v45  ;;  %v4995_v20 = vadd.f32 %v4937_v18, %v2572_v46  ;;  %v2576_v54 = vadd.f32 %v2575_v39, %v4922_v22  ;;  %v2577_v10 = vpop.f32.mrb[63].mxu0  ;;  %v2868_v24 = vadd.f32 %v2836_v49, %v4965_v41 }
 0x57e   : > { %v5002_v4 = vadd.f32 %v4937_v18, %v2574_v25  ;;  %v2578_v17 = vadd.f32 %v2577_v10, %v4922_v22  ;;  %v2845_v27 = vmul.f32 %v2813_v0, %v2717_v63  ;;  %v2869_v11 = vadd.f32 %v2837_v7, %v2709_v33 }
 0x57f   : > { %5431 = vst [vmem:[#allocation14_spill] sm:$0xff] %v4995_v20  ;;  %v2788_v36 = vmul.f32 0.044715, %v4995_v20  ;;  %v5008_v59 = vadd.f32 %v4945_v60, %v2576_v54  ;;  %v5012_v14 = vadd.f32 %v2850_v34, %v4941_v50  ;;  %v2876_v52 = vadd.f32 %v2844_v12, %v4977_v45 }
 0x580   : > { %v2789_v37 = vmul.f32 0.044715, %v5002_v4  ;;  %v2877_v15 = vadd.f32 %v2845_v27, %v2717_v63  ;;  %v5018_v5 = vadd.f32 %v4945_v60, %v2578_v17  ;;  %v2901_v42 = vmul.f32 0.7978846, %v2869_v11 }
 0x581   : > { %5432 = vst [vmem:[#allocation15_spill] sm:$0xff] %v5008_v59  ;;  %v2820_v21 = vmul.f32 %v2788_v36, %v4995_v20  ;;  %v2796_v44 = vmul.f32 0.044715, %v5008_v59  ;;  %v5021_v16 = vmul.f32 0.5, %v2709_v33  ;;  %3728 = vtanh.f32 %v2898_v51 }
 0x582   : > { %v2909_v23 = vmul.f32 0.7978846, %v2877_v15  ;;  %v3725_v1 = vpop.eup %3724  ;;  %v5024_v47 = vadd.f32 %v2858_v38, %v4957_v35  ;;  %v5027_v34 = vmul.f32 0.5, %v2717_v63  ;;  %3730 = vtanh.f32 %v2906_v8 }
 0x583   : > { %v2828_v61 = vmul.f32 %v2796_v44, %v5008_v59  ;;  %v3727_v46 = vpop.eup %3726  ;;  %v5030_v2 = vmul.f32 %v2789_v37, %v5002_v4  ;;  %v2963_v6 = vadd.f32 1.0, %v3725_v1  ;;  %v5033_v49 = vmul.f32 0.5, %v4965_v41 }
 0x584   : > { %v2900_v33 = vmul.f32 0.7978846, %v2868_v24  ;;  %v2852_v51 = vmul.f32 %v2820_v21, %v4995_v20  ;;  %v2797_v0 = vmul.f32 0.044715, %v5018_v5  ;;  %v2971_v39 = vadd.f32 1.0, %v3727_v46 }
 0x585   : > { %v2614_v25 = vpop.f32.mrb[64].mxu1  ;;  %3732 = vtanh.f32 %v2901_v42  ;;  %v5039_v12 = vmul.f32 0.5, %v4977_v45  ;;  %v2908_v54 = vmul.f32 0.7978846, %v2876_v52  ;;  %v2860_v10 = vmul.f32 %v2828_v61, %v5008_v59 }
 0x586   : > { %v2615_v63 = vadd.f32 %v2614_v25, %v4916_v3  ;;  %v2616_v7 = vpop.f32.mrb[65].mxu1  ;;  %3734 = vtanh.f32 %v2909_v23  ;;  %v2995_v11 = vmul.f32 %v2963_v6, %v4951_v40  ;;  %v3003_v36 = vmul.f32 %v2971_v39, %v4962_v58 }
 0x587   : > { %v2667_v41 = vpop.f32.mrb[64].mxu0  ;;  %v2617_v17 = vadd.f32 %v2616_v7, %v4916_v3  ;;  %v2618_v27 = vpop.f32.mrb[66].mxu1  ;;  %3736 = vtanh.f32 %v2900_v33 }
 0x588   : > { %v5046_v38 = vadd.f32 %v4925_v53, %v2615_v63  ;;  %v2668_v8 = vadd.f32 %v2667_v41, %v4916_v3  ;;  %v2669_v24 = vpop.f32.mrb[65].mxu0  ;;  %v2619_v45 = vadd.f32 %v2618_v27, %v4918_v13  ;;  %v2620_v37 = vpop.f32.mrb[67].mxu1  ;;  %v3027_v42 = vpack.c.bf16 %v3003_v36, %v2995_v11 }
 0x589   : > { %v5051_v15 = vadd.f32 %v4925_v53, %v2617_v17  ;;  %v2670_v21 = vadd.f32 %v2669_v24, %v4916_v3  ;;  %v2671_v44 = vpop.f32.mrb[66].mxu0  ;;  %v2621_v40 = vadd.f32 %v2620_v37, %v4918_v13  ;;  %v5085_v27 = vmul.f32 %v2797_v0, %v5018_v5 }
 0x58a   : > { %5433 = vst [vmem:[#allocation16_spill] sm:$0xff] %v5046_v38  ;;  %v2774_v58 = vmul.f32 0.044715, %v5046_v38  ;;  %v5057_v52 = vadd.f32 %v4925_v53, %v2668_v8  ;;  %v5060_v23 = vadd.f32 %v4930_v31, %v2619_v45  ;;  %v2672_v1 = vadd.f32 %v2671_v44, %v4918_v13  ;;  %v2673_v61 = vpop.f32.mrb[67].mxu0  ;;  %3047 = vmatprep.subr.bf16.mxu1 %v3027_v42 }
 0x58b   : > { %v2775_v46 = vmul.f32 0.044715, %v5051_v15  ;;  %v5065_v6 = vadd.f32 %v4925_v53, %v2670_v21  ;;  %v5068_v3 = vadd.f32 %v4930_v31, %v2621_v40  ;;  %v2674_v33 = vadd.f32 %v2673_v61, %v4918_v13  ;;  %v5071_v25 = vpop.eup %3728 }
 0x58c   : > { %5434 = vst [vmem:[#allocation17_spill] sm:$0xff] %v5057_v52  ;;  %v2806_v39 = vmul.f32 %v2774_v58, %v5046_v38  ;;  %v2776_v63 = vmul.f32 0.044715, %v5057_v52  ;;  %v2782_v7 = vmul.f32 0.044715, %v5060_v23  ;;  %v5077_v41 = vadd.f32 %v4930_v31, %v2672_v1  ;;  %v5079_v17 = vpop.eup %3730 }
 0x58d   : > { %v5082_v53 = vadd.f32 %v2852_v51, %v4995_v20  ;;  %v2624_v13 = vpop.f32.mrb[68].mxu1  ;;  %3738 = vtanh.f32 %v2908_v54  ;;  %v5088_v11 = vmul.f32 0.5, %v4949_v32  ;;  %v2777_v8 = vmul.f32 0.044715, %v5065_v6 }
 0x58e   : > { %5435 = vst [vmem:[#allocation18_spill] sm:$0xff] %v5077_v41  ;;  %v2808_v36 = vmul.f32 %v2776_v63, %v5057_v52  ;;  %v2784_v24 = vmul.f32 0.044715, %v5077_v41  ;;  %v5094_v45 = vadd.f32 %v4930_v31, %v2674_v33  ;;  %v2626_v37 = vpop.f32.mrb[69].mxu1  ;;  %v5097_v21 = vadd.f32 %v2860_v10, %v5008_v59 }
 0x58f   : > { %5436 = vst [vmem:[#allocation19_spill] sm:$0xff] %v5088_v11  ;;  %v3733_v51 = vpop.eup %3732  ;;  %v2625_v0 = vadd.f32 %v2624_v13, %v4920_v48  ;;  %v2677_v54 = vpop.f32.mrb[68].mxu0  ;;  %v5101_v40 = vmul.f32 0.5, %v4969_v57  ;;  %v5105_v42 = vmul.f32 %v4985_v43, %v4949_v32  ;;  %v2838_v31 = vmul.f32 %v2806_v39, %v5046_v38 }
 0x590   : > { %v2628_v44 = vpop.f32.mrb[70].mxu1  ;;  %v3735_v58 = vpop.eup %3734  ;;  %v5109_v1 = vmul.f32 %v2775_v46, %v5051_v15  ;;  %v2814_v10 = vmul.f32 %v2782_v7, %v5060_v23  ;;  %v2783_v61 = vmul.f32 0.044715, %v5068_v3  ;;  %v2816_v13 = vmul.f32 %v2784_v24, %v5077_v41 }
 0x591   : > { %5437 = vst [vmem:[#allocation20_spill] sm:$0xff] %v5101_v40  ;;  %v2679_v33 = vpop.f32.mrb[69].mxu0  ;;  %v2630_v63 = vpop.f32.mrb[71].mxu1  ;;  %v5115_v56 = vadd.f32 %v4937_v18, %v2625_v0  ;;  %v2678_v43 = vadd.f32 %v2677_v54, %v4920_v48  ;;  %v2627_v19 = vadd.f32 %v2626_v37, %v4920_v48  ;;  %v2840_v46 = vmul.f32 %v2808_v36, %v5057_v52 }
 0x592   : > { %v2681_v28 = vpop.f32.mrb[70].mxu0  ;;  %v3737_v39 = vpop.eup %3736  ;;  %v5121_v29 = vmul.f32 %v2777_v8, %v5065_v6  ;;  %v2785_v7 = vmul.f32 0.044715, %v5094_v45  ;;  %v2680_v62 = vadd.f32 %v2679_v33, %v4920_v48  ;;  %v2629_v37 = vadd.f32 %v2628_v44, %v4922_v22 }
 0x593   : > { %5438 = vst [vmem:[#allocation21_spill] sm:$0xff] %v5115_v56  ;;  %v2683_v55 = vpop.f32.mrb[71].mxu0  ;;  %v2790_v24 = vmul.f32 0.044715, %v5115_v56  ;;  %v5127_v0 = vadd.f32 %v4937_v18, %v2678_v43  ;;  %v5130_v54 = vadd.f32 %v4937_v18, %v2627_v19  ;;  %v2846_v36 = vmul.f32 %v2814_v10, %v5060_v23 }
 0x594   : > { %v5135_v8 = vadd.f32 %v4937_v18, %v2680_v62  ;;  %v2682_v40 = vadd.f32 %v2681_v28, %v4922_v22  ;;  %v2631_v48 = vadd.f32 %v2630_v63, %v4922_v22  ;;  %v2848_v33 = vmul.f32 %v2816_v13, %v5077_v41 }
 0x595   : > { %v2822_v11 = vmul.f32 %v2790_v24, %v5115_v56  ;;  %v2792_v43 = vmul.f32 0.044715, %v5127_v0  ;;  %v5143_v19 = vadd.f32 %v4945_v60, %v2629_v37  ;;  %v2791_v44 = vmul.f32 0.044715, %v5130_v54 }
 0x596   : > { %v2793_v10 = vmul.f32 0.044715, %v5135_v8  ;;  %v5148_v62 = vadd.f32 %v4945_v60, %v2682_v40  ;;  %v2684_v28 = vadd.f32 %v2683_v55, %v4922_v22  ;;  %v5152_v63 = vmul.f32 %v2783_v61, %v5068_v3 }
 0x597   : > { %v3739_v18 = vpop.eup %3738  ;;  %v2854_v13 = vmul.f32 %v2822_v11, %v5115_v56  ;;  %v2798_v24 = vmul.f32 0.044715, %v5143_v19  ;;  %v5157_v37 = vadd.f32 %v4945_v60, %v2631_v48  ;;  %v5160_v59 = vadd.f32 %v2838_v31, %v5046_v38 }
 0x598   : > { %v5163_v20 = vadd.f32 %v2840_v46, %v5057_v52  ;;  %v5166_v40 = vmul.f32 %v2785_v7, %v5094_v45  ;;  %v2800_v55 = vmul.f32 0.044715, %v5148_v62  ;;  %v5170_v22 = vadd.f32 %v2846_v36, %v5060_v23 }
 0x599   : > { %v2824_v11 = vmul.f32 %v2792_v43, %v5127_v0  ;;  %v5174_v61 = vadd.f32 %v4945_v60, %v2684_v28  ;;  %v2965_v48 = vadd.f32 1.0, %v3733_v51  ;;  %v5177_v31 = vadd.f32 %v2848_v33, %v5077_v41 }
 0x59a   : > { %v5180_v46 = vmul.f32 %v2791_v44, %v5130_v54  ;;  %v5183_v7 = vmul.f32 %v2793_v10, %v5135_v8  ;;  %v2973_v52 = vadd.f32 1.0, %v3735_v58  ;;  %v5186_v38 = vadd.f32 %v2854_v13, %v5115_v56 }
 0x59b   : > { %v2830_v36 = vmul.f32 %v2798_v24, %v5143_v19  ;;  %v2799_v43 = vmul.f32 0.044715, %v5157_v37  ;;  %v2962_v60 = vadd.f32 1.0, %v5071_v25  ;;  %v2832_v51 = vmul.f32 %v2800_v55, %v5148_v62 }
 0x59c   : > { %5439 = vst [vmem:[#allocation22_spill] sm:$0xff] %v5186_v38  ;;  %v2997_v33 = vmul.f32 %v2965_v48, %v5021_v16  ;;  %v3005_v44 = vmul.f32 %v2973_v52, %v5027_v34  ;;  %v2970_v28 = vadd.f32 1.0, %v5079_v17  ;;  %v2856_v10 = vmul.f32 %v2824_v11, %v5127_v0 }
 0x59d   : > { %v2801_v58 = vmul.f32 0.044715, %v5174_v61  ;;  %v2964_v13 = vadd.f32 1.0, %v3737_v39  ;;  %v2972_v56 = vadd.f32 1.0, %v3739_v18  ;;  %v2994_v24 = vmul.f32 %v2962_v60, %v4953_v30 }
 0x59e   : > { %v3029_v41 = vpack.c.bf16 %v3005_v44, %v2997_v33  ;;  %v3002_v38 = vmul.f32 %v2970_v28, %v4959_v9  ;;  %v2859_v25 = vmul.f32 %v4999_v26, %v4969_v57  ;;  %v2862_v16 = vmul.f32 %v2830_v36, %v5143_v19 }
 0x59f   : > { %v2996_v34 = vmul.f32 %v2964_v13, %v5033_v49  ;;  %v3004_v52 = vmul.f32 %v2972_v56, %v5039_v12  ;;  %v2883_v17 = vadd.f32 %v5105_v42, %v4949_v32  ;;  %v2864_v39 = vmul.f32 %v2832_v51, %v5148_v62  ;;  %v5441_v13 = vld [vmem:[#allocation15_spill] sm:$0xff] }
 0x5a0   : > { %3088 = vmatprep.subr.bf16.mxu0 %v3029_v41  ;;  %v3026_v18 = vpack.c.bf16 %v3002_v38, %v2994_v24  ;;  %v2891_v30 = vadd.f32 %v2859_v25, %v4969_v57  ;;  %v2853_v9 = vmul.f32 %v5030_v2, %v5002_v4  ;;  %v2831_v26 = vmul.f32 %v2799_v43, %v5157_v37 }
 0x5a1   : > { %v3028_v55 = vpack.c.bf16 %v3004_v52, %v2996_v34  ;;  %v2915_v11 = vmul.f32 0.7978846, %v2883_v17  ;;  %v2861_v49 = vmul.f32 %v5085_v27, %v5018_v5  ;;  %v5214_v56 = vadd.f32 %v2856_v10, %v5127_v0  ;;  %v5440_v10 = vld [vmem:[#allocation14_spill] sm:$0xff] }
 0x5a2   : > { %3048 = vmatpush1.bf16.msra.mxu1 %v3026_v18  ;;  %v2923_v32 = vmul.f32 0.7978846, %v2891_v30  ;;  %v2885_v12 = vadd.f32 %v2853_v9, %v5002_v4  ;;  %v2914_v38 = vmul.f32 0.7978846, %v5012_v14  ;;  %v5219_v57 = vadd.f32 %v2862_v16, %v5143_v19 }
 0x5a3   : > { %v5222_v2 = vmul.f32 %v2801_v58, %v5174_v61  ;;  %3089 = vmatpush1.bf16.msra.mxu0 %v3028_v55  ;;  %3740 = vtanh.f32 %v2915_v11  ;;  %v2893_v41 = vadd.f32 %v2861_v49, %v5018_v5  ;;  %v5226_v27 = vadd.f32 %v2864_v39, %v5148_v62 }
 0x5a4   : > { %3742 = vtanh.f32 %v2923_v32  ;;  %v2917_v42 = vmul.f32 0.7978846, %v2885_v12  ;;  %v2922_v48 = vmul.f32 0.7978846, %v5024_v47  ;;  %v5230_v36 = vmul.f32 0.5, %v5002_v4  ;;  %v5442_v32 = vld [vmem:[#allocation19_spill] sm:$0xff] }
 0x5a5   : > { %v2925_v14 = vmul.f32 0.7978846, %v2893_v41  ;;  %3744 = vtanh.f32 %v2914_v38  ;;  %v2916_v43 = vmul.f32 0.7978846, %v5082_v53  ;;  %v2924_v60 = vmul.f32 0.7978846, %v5097_v21 }
 0x5a6   : > { %3746 = vtanh.f32 %v2917_v42  ;;  %v2839_v51 = vmul.f32 %v5109_v1, %v5051_v15  ;;  %v2847_v33 = vmul.f32 %v5152_v63, %v5068_v3  ;;  %v2765_v44 = vmul.f32 0.5, %v5018_v5  ;;  %v5443_v41 = vld [vmem:[#allocation20_spill] sm:$0xff] }
 0x5a7   : > { %3748 = vtanh.f32 %v2925_v14  ;;  %v2754_v47 = vmul.f32 0.5, %v4941_v50  ;;  %v2841_v4 = vmul.f32 %v5121_v29, %v5065_v6  ;;  %v2849_v21 = vmul.f32 %v5166_v40, %v5094_v45 }
 0x5a8   : > { %3750 = vtanh.f32 %v2922_v48  ;;  %v2871_v53 = vadd.f32 %v2839_v51, %v5051_v15  ;;  %v2879_v28 = vadd.f32 %v2847_v33, %v5068_v3  ;;  %v2762_v1 = vmul.f32 0.5, %v4957_v35 }
 0x5a9   : > { %v2756_v63 = vmul.f32 0.5, %v5440_v10  ;;  %3752 = vtanh.f32 %v2916_v43  ;;  %v2873_v5 = vadd.f32 %v2841_v4, %v5065_v6  ;;  %v2881_v29 = vadd.f32 %v2849_v21, %v5094_v45  ;;  %v5444_v43 = vld [vmem:[#allocation16_spill] sm:$0xff] }
 0x5aa   : > { %3754 = vtanh.f32 %v2924_v60  ;;  %v2903_v50 = vmul.f32 0.7978846, %v2871_v53  ;;  %v2911_v58 = vmul.f32 0.7978846, %v2879_v28  ;;  %v2764_v24 = vmul.f32 0.5, %v5441_v13 }
 0x5ab   : > { %v5252_v25 = vmul.f32 0.5, %v5051_v15  ;;  %v2905_v16 = vmul.f32 0.7978846, %v2873_v5  ;;  %v2855_v40 = vmul.f32 %v5180_v46, %v5130_v54  ;;  %v5257_v35 = vmul.f32 0.5, %v5068_v3 }
 0x5ac   : > { %3756 = vtanh.f32 %v2903_v50  ;;  %v2913_v34 = vmul.f32 0.7978846, %v2881_v29  ;;  %v2902_v52 = vmul.f32 0.7978846, %v5160_v59  ;;  %v5261_v39 = vmul.f32 0.5, %v5065_v6 }
 0x5ad   : > { %v3741_v17 = vpop.eup %3740  ;;  %3758 = vtanh.f32 %v2911_v58  ;;  %v5264_v18 = vmul.f32 0.5, %v5094_v45  ;;  %v2910_v15 = vmul.f32 0.7978846, %v5170_v22  ;;  %v2904_v3 = vmul.f32 0.7978846, %v5163_v20 }
 0x5ae   : > { %v3743_v30 = vpop.eup %3742  ;;  %v2979_v9 = vadd.f32 1.0, %v3741_v17  ;;  %3760 = vtanh.f32 %v2905_v16  ;;  %v2863_v46 = vmul.f32 %v2831_v26, %v5157_v37  ;;  %v2912_v59 = vmul.f32 0.7978846, %v5177_v31 }
 0x5af   : > { %v3745_v55 = vpop.eup %3744  ;;  %v2987_v11 = vadd.f32 1.0, %v3743_v30  ;;  %3762 = vtanh.f32 %v2913_v34  ;;  %v2887_v6 = vadd.f32 %v2855_v40, %v5130_v54  ;;  %v2742_v60 = vmul.f32 0.5, %v5444_v43 }
 0x5b0   : > { %v3747_v49 = vpop.eup %3746  ;;  %v3011_v45 = vmul.f32 %v2979_v9, %v5442_v32  ;;  %v2978_v12 = vadd.f32 1.0, %v3745_v55  ;;  %3764 = vtanh.f32 %v2902_v52  ;;  %v2895_v22 = vadd.f32 %v2863_v46, %v5157_v37  ;;  %v5445_v9 = vld [vmem:[#allocation17_spill] sm:$0xff]  ;;  %v5446_v46 = vld [vmem:[#allocation22_spill] sm:$0xff] }
 0x5b1   : > { %v3749_v38 = vpop.eup %3748  ;;  %v3019_v42 = vmul.f32 %v2987_v11, %v5443_v41  ;;  %v2981_v20 = vadd.f32 1.0, %v3747_v49  ;;  %3766 = vtanh.f32 %v2910_v15  ;;  %v2919_v26 = vmul.f32 0.7978846, %v2887_v6 }
 0x5b2   : > { %v3751_v48 = vpop.eup %3750  ;;  %v2989_v14 = vadd.f32 1.0, %v3749_v38  ;;  %3768 = vtanh.f32 %v2904_v3  ;;  %v2927_v31 = vmul.f32 0.7978846, %v2895_v22  ;;  %v3010_v53 = vmul.f32 %v2978_v12, %v2754_v47 }
 0x5b3   : > { %v3753_v51 = vpop.eup %3752  ;;  %v3035_v33 = vpack.c.bf16 %v3019_v42, %v3011_v45  ;;  %v2986_v4 = vadd.f32 1.0, %v3751_v48  ;;  %3770 = vtanh.f32 %v2912_v59  ;;  %v3013_v21 = vmul.f32 %v2981_v20, %v5230_v36  ;;  %v5447_v42 = vld [vmem:[#allocation18_spill] sm:$0xff] }
 0x5b4   : > { %v3755_v28 = vpop.eup %3754  ;;  %v3021_v10 = vmul.f32 %v2989_v14, %v2765_v44  ;;  %v2980_v5 = vadd.f32 1.0, %v3753_v51  ;;  %3772 = vtanh.f32 %v2919_v26  ;;  %v2857_v29 = vmul.f32 %v5183_v7, %v5135_v8 }
 0x5b5   : > { %3049 = vmatprep.subr.bf16.mxu1 %v3035_v33  ;;  %v3018_v50 = vmul.f32 %v2986_v4, %v2762_v1  ;;  %v2988_v58 = vadd.f32 1.0, %v3755_v28  ;;  %3774 = vtanh.f32 %v2927_v31  ;;  %v2750_v34 = vmul.f32 0.5, %v5060_v23 }
 0x5b6   : > { %v3757_v13 = vpop.eup %3756  ;;  %v3037_v16 = vpack.c.bf16 %v3021_v10, %v3013_v21  ;;  %v3012_v40 = vmul.f32 %v2980_v5, %v2756_v63  ;;  %v2865_v47 = vmul.f32 %v5222_v2, %v5174_v61  ;;  %v2889_v15 = vadd.f32 %v2857_v29, %v5135_v8  ;;  %v5288_v2 = vld [vmem:[%s5389_s5 + $0x4] sm:$0x3] }
 0x5b7   : > { %v3759_v52 = vpop.eup %3758  ;;  %v3034_v36 = vpack.c.bf16 %v3018_v50, %v3010_v53  ;;  %v3020_v44 = vmul.f32 %v2988_v58, %v2764_v24  ;;  %v2967_v17 = vadd.f32 1.0, %v3757_v13  ;;  %v2744_v3 = vmul.f32 0.5, %v5445_v9 }
 0x5b8   : > { %v3761_v1 = vpop.eup %3760  ;;  %3090 = vmatprep.subr.bf16.mxu0 %v3037_v16  ;;  %v2975_v30 = vadd.f32 1.0, %v3759_v52  ;;  %v2897_v7 = vadd.f32 %v2865_v47, %v5174_v61  ;;  %v2918_v63 = vmul.f32 0.7978846, %v5446_v46  ;;  %v2921_v59 = vmul.f32 0.7978846, %v2889_v15 }
 0x5b9   : > { %v3763_v55 = vpop.eup %3762  ;;  %3050 = vmatpush1.bf16.msra.mxu1 %v3034_v36  ;;  %v3036_v23 = vpack.c.bf16 %v3020_v44, %v3012_v40  ;;  %v2999_v24 = vmul.f32 %v2967_v17, %v5252_v25  ;;  %v2969_v11 = vadd.f32 1.0, %v3761_v1  ;;  %v2926_v12 = vmul.f32 0.7978846, %v5219_v57  ;;  %v5449_v17 = vld [vmem:[#allocation21_spill] sm:$0xff] }
 0x5ba   : > { %v3765_v6 = vpop.eup %3764  ;;  %v3007_v49 = vmul.f32 %v2975_v30, %v5257_v35  ;;  %v2977_v32 = vadd.f32 1.0, %v3763_v55  ;;  %v2929_v45 = vmul.f32 0.7978846, %v2897_v7  ;;  %v2752_v20 = vmul.f32 0.5, %v5447_v42 }
 0x5bb   : > { %v3767_v22 = vpop.eup %3766  ;;  %3091 = vmatpush1.bf16.msra.mxu0 %v3036_v23  ;;  %v3001_v38 = vmul.f32 %v2969_v11, %v5261_v39  ;;  %v2966_v41 = vadd.f32 1.0, %v3765_v6  ;;  %3776 = vtanh.f32 %v2921_v59  ;;  %v2759_v31 = vmul.f32 0.5, %v5130_v54 }
 0x5bc   : > { %v3769_v26 = vpop.eup %3768  ;;  %3460 = vmatmul.mubr.msk.bf16.vlgmr.msra.gmra.mrb[72].mxu1 %vm1110_vm3, %v5288_v2  ;;  %v3031_v25 = vpack.c.bf16 %v3007_v49, %v2999_v24  ;;  %v3009_v48 = vmul.f32 %v2977_v32, %v5264_v18  ;;  %v2974_v35 = vadd.f32 1.0, %v3767_v22  ;;  %3778 = vtanh.f32 %v2929_v45 }
 0x5bd   : > { %v3771_v14 = vpop.eup %3770  ;;  %v2998_v43 = vmul.f32 %v2966_v41, %v2742_v60  ;;  %v2968_v57 = vadd.f32 1.0, %v3769_v26  ;;  %3780 = vtanh.f32 %v2918_v63  ;;  %v5448_v39 = vmov 0  }
 0x5be   : > { %3161 = vmatprep.mubr.bf16.mxu1 %v5448_v39  ;;  %v3773_v51 = vpop.eup %3772  ;;  %3461 = vmatmul.mubr.msk.bf16.vlgmr.msra.gmra.mrb[72].mxu0 %vm1110_vm3, %v5288_v2  ;;  %v3033_v33 = vpack.c.bf16 %v3009_v48, %v3001_v38  ;;  %v3006_v4 = vmul.f32 %v2974_v35, %v2750_v34  ;;  %v2976_v53 = vadd.f32 1.0, %v3771_v14  ;;  %3782 = vtanh.f32 %v2926_v12  ;;  %v3236_v12 = vpop.permute.xlu0 %3235 }
 0x5bf   : > { %3129 = vmatprep.subr.bf16.mxu1 %v3031_v25  ;;  %v3775_v18 = vpop.eup %3774  ;;  %v2767_v28 = vmul.f32 0.5, %v5157_v37  ;;  %v2983_v21 = vadd.f32 1.0, %v3773_v51  ;;  %v2920_v60 = vmul.f32 0.7978846, %v5214_v56  ;;  %v2928_v54 = vmul.f32 0.7978846, %v5226_v27  ;;  %3202 = vmatprep.mubr.bf16.mxu0 %v5448_v39 }
 0x5c0   : > { %3170 = vmatprep.subr.bf16.mxu0 %v3033_v33  ;;  %v3030_v10 = vpack.c.bf16 %v3006_v4, %v2998_v43  ;;  %v3000_v5 = vmul.f32 %v2968_v57, %v2744_v3  ;;  %v3008_v50 = vmul.f32 %v2976_v53, %v2752_v20  ;;  %v2991_v58 = vadd.f32 1.0, %v3775_v18  ;;  %v5450_v20 = vld [vmem:[#allocation9_spill] sm:$0xff]  ;;  %v5452_v57 = vld [vmem:[#allocation10_spill] sm:$0xff] }
 0x5c1   : > { %3784 = vtanh.f32 %v2920_v60  ;;  %v3015_v13 = vmul.f32 %v2983_v21, %v2759_v31  ;;  %v2761_v47 = vmul.f32 0.5, %v5135_v8  ;;  %v2769_v52 = vmul.f32 0.5, %v5174_v61  ;;  %v5451_v25 = vld [vmem:[#allocation13_spill] sm:$0xff]  ;;  %v5453_v21 = vld [vmem:[#allocation11_spill] sm:$0xff] }
 0x5c2   : > { %3130 = vmatpush1.bf16.msra.mxu1 %v3030_v10  ;;  %v3032_v29 = vpack.c.bf16 %v3008_v50, %v3000_v5  ;;  %v3023_v16 = vmul.f32 %v2991_v58, %v2767_v28  ;;  %3786 = vtanh.f32 %v2928_v54  ;;  %v2758_v15 = vmul.f32 0.5, %v5449_v17 }
 0x5c3   : > { %v2766_v3 = vmul.f32 0.5, %v5143_v19  ;;  %v2760_v61 = vmul.f32 0.5, %v5127_v0  ;;  %v2768_v59 = vmul.f32 0.5, %v5148_v62  ;;  %v3243_v26 = vrot.slane %v3236_v12, %v5450_v20 }
 0x5c4   : > { %3171 = vmatpush1.bf16.msra.mxu0 %v3032_v29  ;;  %v3039_v37 = vpack.c.bf16 %v3023_v16, %v3015_v13  ;;  %v5454_v29 = vld [vmem:[#allocation12_spill] sm:$0xff] }
 0x5c5   : > { %v3777_v40 = vpop.eup %3776 }
 0x5c6   : > { %v3779_v34 = vpop.eup %3778  ;;  %3131 = vmatprep.subr.bf16.mxu1 %v3039_v37  ;;  %v2985_v56 = vadd.f32 1.0, %v3777_v40 }
 0x5c7   : > { %v3781_v27 = vpop.eup %3780  ;;  %v2993_v36 = vadd.f32 1.0, %v3779_v34 }
 0x5c8   : > { %v3783_v44 = vpop.eup %3782  ;;  %v2982_v1 = vadd.f32 1.0, %v3781_v27  ;;  %v3017_v30 = vmul.f32 %v2985_v56, %v2761_v47 }
 0x5c9   : > { %v3025_v9 = vmul.f32 %v2993_v36, %v2769_v52  ;;  %v2990_v7 = vadd.f32 1.0, %v3783_v44 }
 0x5ca   : > { %v3014_v55 = vmul.f32 %v2982_v1, %v2758_v15 }
 0x5cb   : > { %v3785_v46 = vpop.eup %3784  ;;  %v3041_v63 = vpack.c.bf16 %v3025_v9, %v3017_v30  ;;  %v3022_v23 = vmul.f32 %v2990_v7, %v2766_v3 }
 0x5cc   : > { %v3787_v24 = vpop.eup %3786  ;;  %v2984_v11 = vadd.f32 1.0, %v3785_v46 }
 0x5cd   : > { %3172 = vmatprep.subr.bf16.mxu0 %v3041_v63  ;;  %v3038_v8 = vpack.c.bf16 %v3022_v23, %v3014_v55  ;;  %v2992_v6 = vadd.f32 1.0, %v3787_v24 }
 0x5ce   : > { %v3016_v49 = vmul.f32 %v2984_v11, %v2760_v61 }
 0x5cf   : > { %3132 = vmatpush1.bf16.msra.mxu1 %v3038_v8  ;;  %v3024_v32 = vmul.f32 %v2992_v6, %v2768_v59 }
 0x5d1   : > { %v3040_v19 = vpack.c.bf16 %v3024_v32, %v3016_v49 }
 0x5d2   : > { %3462 = vmatmul.mubr.msk.bf16.vlgmr.msra.gmra.mrb[76].mxu1 %vm1110_vm3, %v5288_v2 }
 0x5d3   : > { %3173 = vmatpush1.bf16.msra.mxu0 %v3040_v19 }
 0x5d6   : > { %3463 = vmatmul.mubr.msk.bf16.vlgmr.msra.gmra.mrb[76].mxu0 %vm1110_vm3, %v5288_v2 }
 0x68f   : > { %v3081_v45 = vpop.f32.mrb[72].mxu1 }
 0x690   : > { %v3083_v22 = vpop.f32.mrb[73].mxu1 }
 0x691   : > { %v3122_v38 = vpop.f32.mrb[72].mxu0  ;;  %v3219_v0 = vcombine.low %v3081_v45, %v3083_v22  ;;  %v3085_v62 = vpop.f32.mrb[74].mxu1 }
 0x692   : > { %v3124_v41 = vpop.f32.mrb[73].mxu0  ;;  %v3086_v42 = vpop.f32.mrb[75].mxu1 }
 0x693   : > { %v3227_v48 = vadd.f32 %v3219_v0, %v5451_v25  ;;  %v3220_v35 = vcombine.low %v3122_v38, %v3124_v41  ;;  %v3126_v14 = vpop.f32.mrb[74].mxu0 }
 0x694   : > { %v3127_v2 = vpop.f32.mrb[75].mxu0 }
 0x695   : > { %v3245_v43 = vadd.f32 %v3243_v26, %v3227_v48  ;;  %v3228_v31 = vadd.f32 %v3220_v35, %v5452_v57 }
 0x697   : > { %3249 = vst [vmem:[%s309_s12] sm:$0xff] %v3245_v43  ;;  %v3246_v39 = vadd.f32 %v3243_v26, %v3228_v31 }
 0x699   : > { %3250 = vst [vmem:[%s309_s12 + $0x8] sm:$0xff] %v3246_v39 }
 0x6a5   : > { %v3163_v51 = vpop.f32.mrb[76].mxu1 }
 0x6a6   : > { %v3165_v33 = vpop.f32.mrb[77].mxu1 }
 0x6a7   : > { %v3221_v4 = vcombine.low %v3163_v51, %v3165_v33  ;;  %v3167_v53 = vpop.f32.mrb[78].mxu1 }
 0x6a8   : > { %v3168_v18 = vpop.f32.mrb[79].mxu1 }
 0x6a9   : > { %v3204_v28 = vpop.f32.mrb[76].mxu0  ;;  %v3229_v60 = vadd.f32 %v3221_v4, %v5453_v21 }
 0x6aa   : > { %v3206_v54 = vpop.f32.mrb[77].mxu0 }
 0x6ab   : > { %v3247_v10 = vadd.f32 %v3243_v26, %v3229_v60  ;;  %v3222_v5 = vcombine.low %v3204_v28, %v3206_v54  ;;  %v3208_v50 = vpop.f32.mrb[78].mxu0 }
 0x6ac   : > { %v3209_v58 = vpop.f32.mrb[79].mxu0 }
 0x6ad   : > { %3251 = vst [vmem:[%s309_s12 + $0x10] sm:$0xff] %v3247_v10  ;;  %v3230_v13 = vadd.f32 %v3222_v5, %v5454_v29 }
 0x6af   : > { %v3248_v16 = vadd.f32 %v3243_v26, %v3230_v13 }
 0x6b1   : > { %3252 = vst [vmem:[%s309_s12 + $0x18] sm:$0xff] %v3248_v16 }
 0x6b2   : > { %3805 = shalt.err (!%p3802_p7)
}
 0x6b3   : > { %s3806_s27 = scalar_lea.hbm %s5329_s13, 512  ;;  %s3810_s12 = scalar_lea.hbm %s5391_s7, 2048 }
 0x6b4   : > { %p3807_p9 = scmp.ne.s32.totalorder %s5329_s13, %s3806_s27  ;;  %p3811_p12 = scmp.lt.u32.totalorder %s5329_s13, %s5391_s7 }
 0x6b5   : > { %p3812_p13 = scmp.lt.u32.totalorder %s3810_s12, %s3806_s27  ;;  %p3814_p1 = scmp.lt.u32.totalorder %s3806_s27, %s5329_s13 }
 0x6b6   : > { %p3808_p10 = pnand %p3807_p9, %p3983_p3 }
 0x6b7   : > { %p3813_p0 = por %p3812_p13, %p3811_p12 }
 0x6b8   : > { %p3809_p11 = pneg %p3808_p10 }
 0x6b9   : > { %p3815_p2 = por %p3814_p1, %p3813_p0 }
 0x6bb   : > { %p3816_p4 = pnand %p3815_p2, %p3809_p11 }
 0x6bd   : > { %3819 = shalt.err (!%p3816_p4)
}
 0x6be   : > { %3512 = dma.vmem_to_hbm [thread:$0]  (%p3983_p3), %s5331_s11, 512, %s5329_s13, %s3254_s9  }
 0x6bf PF: > { %p3518_p5 = scmp.ge.s32.totalorder %s3886_s8, 2  ;;  %s3282_s30 = sand.u32 1, %s3858_s24  }
 0x6c0   : > { %s3283_s28 = scalar_lea.sflag [#allocation3], %s3282_s30 }
 0x6c1   : > { %p3515_p6 = pnand %p3518_p5, %p3992_p8 }
 0x6c3   : > { %3853 = dma.done.wait (!%p3515_p6), %s3283_s28, 512  }
 0x6c4   : > { %3855 = vsyncadd (!%p3515_p6), %s3283_s28, 4294966784  ;;  %s20_s8 = sadd.s32 1, %s3886_s8   ;;  %s5455_s27 = sld [smem:[#allocation5_spill]] }
 0x6c5   : > { %p17_p7 = scmp.ge.s32.totalorder %s20_s8, 6   ;;  %s5456_s28 = sld [smem:[#allocation6_spill]] }
 0x6c6   : > { %s5457_s29 = sld [smem:[#allocation7_spill]]  ;;  %s5458_s30 = sld [smem:[#allocation8_spill]] }
 0x6c7   : > { %s5459_s24 = smov %s3862_s25  ;;  %s5460_s25 = smov %s3866_s26 }
 0x6c8   : > { %s5461_s26 = smov %s4001_s19  ;;  %19 = sbr.rel (!%p17_p7) target bundleno = 5 (0x5), region = 96 }
 0x6cf   :  { %3288 = vsyncpa [#allocation3], 1 }
 0x6d0   :  { %3290 = vsyncpa [#allocation3 + $0x1], 1 }

</bundles_post_ra>
